<compile_context>
chip_gen: v7x
topology: tpu7x:2x2x1
jax: 0.10.0
libtpu: 0.0.40
codegen_flags: <defaults>
</compile_context>

<pallas_src>
import functools

import jax
import jax.numpy as jnp
from jax import lax
from jax.experimental import pallas as pl
from jax.experimental.pallas import tpu as pltpu


# ----------------------------------------------------------------------------
# Config (mirrors the fields read in My_Model.__init__)
# ----------------------------------------------------------------------------
CONFIG = dict(
    dim_each_feedback=16,
    attention_hidden_size=32,
    coe_lambda=0.5,
    topk_u2u=4,
    topk_i2i=4,
    epsilon_u2u=0.1,
    epsilon_i2i=0.1,
    num_pers=4,
    metric_type="weighted_cosine",
    graph_include_self=True,
    graph_module="lightgcn",
    n_layers=2,
    behavior_name=["view", "cart", "buy"],
    behavior_type=[0, 0, 1],          # -> num_coarse = 2 feedback types
    u2u_flag=True,
    i2i_flag=True,
    batch_norm=False,
    dropout=0.0,
    denoise_flag=False,
    sparse_graph_flag=False,          # dense epsilon-threshold graph learning
    graph_learn=True,
    graph_learn_regularization=False,
)

NUM_USERS = 24
NUM_ITEMS = 40
NPAD = 64                             # both graphs padded to 64 nodes (sublane multiple)


# ----------------------------------------------------------------------------
# Pallas kernel 1: fused GraphLearner (u2u + i2i in ONE launch, single grid step)
#   - perspectives unrolled in-kernel, accumulate in vregs
#   - NT dot_general for the Gram matrix (no transpose copy)
#   - output is one lane-dense (64, 128) slab: lanes [0:64] = u2u, [64:128] = i2i
# ----------------------------------------------------------------------------
def _graph_learner_kernel(ue_ref, ie_ref, wu_ref, wi_ref, adj_ref, out_ref,
                          *, num_pers, eps_u, eps_i, coe_lambda):
    def mp_cosine(e, w_all):
        acc = jnp.zeros((e.shape[0], e.shape[0]), jnp.float32)
        for p in range(num_pers):                       # static unrolled loop
            w = w_all[p:p + 1, :]                       # (1, D), stays 2-D
            ew = e * w                                  # (N, D)
            inv_norm = lax.rsqrt(jnp.sum(ew * ew, axis=-1, keepdims=True) + 1e-12)
            ewn = ew * inv_norm
            acc = acc + lax.dot_general(                # NT matmul, no materialized .T
                ewn, ewn,
                dimension_numbers=(((1,), (1,)), ((), ())),
                preferred_element_type=jnp.float32)
        return acc * (1.0 / num_pers)

    def threshold_normalize(att, eps):
        att = jnp.where(att > eps, att, 0.0)            # epsilon neighbourhood
        row_sum = jnp.sum(att, axis=-1, keepdims=True)
        return att / (row_sum + 1e-12)                  # row normalize

    att_u = threshold_normalize(mp_cosine(ue_ref[...], wu_ref[...]), eps_u)   # (64, 64)
    att_i = threshold_normalize(mp_cosine(ie_ref[...], wi_ref[...]), eps_i)   # (64, 64)
    att_slab = jnp.concatenate([att_u, att_i], axis=-1)                       # (64, 128)
    out_ref[...] = coe_lambda * adj_ref[...] + (1.0 - coe_lambda) * att_slab


def learn_graphs_fused(user_emb, item_emb, w_u2u, w_i2i, u2u_adj, i2i_adj,
                       *, eps_u, eps_i, coe_lambda):
    nu, d = user_emb.shape
    ni, _ = item_emb.shape
    p = w_u2u.shape[0]

    # zero-pad both graphs to NPAD nodes; padded rows have zero embedding ->
    # zero similarity -> thresholded away -> valid sub-blocks are unchanged.
    ue = jnp.zeros((NPAD, d), jnp.float32).at[:nu].set(user_emb)
    ie = jnp.zeros((NPAD, d), jnp.float32).at[:ni].set(item_emb)
    adj_slab = jnp.zeros((NPAD, 2 * NPAD), jnp.float32)
    adj_slab = adj_slab.at[:nu, :nu].set(u2u_adj)
    adj_slab = adj_slab.at[:ni, NPAD:NPAD + ni].set(i2i_adj)

    kernel = functools.partial(_graph_learner_kernel, num_pers=p,
                               eps_u=float(eps_u), eps_i=float(eps_i),
                               coe_lambda=float(coe_lambda))
    cost = pl.CostEstimate(
        flops=int(2 * p * 2 * NPAD * d * NPAD + 16 * NPAD * NPAD),
        transcendentals=int(2 * p * NPAD),
        bytes_accessed=int(4 * (2 * NPAD * d + 2 * p * d + 2 * NPAD * 2 * NPAD)))

    out = pl.pallas_call(
        kernel,
        out_shape=jax.ShapeDtypeStruct((NPAD, 2 * NPAD), jnp.float32),
        grid_spec=pltpu.PrefetchScalarGridSpec(
            num_scalar_prefetch=0,
            grid=(1,),
            in_specs=[
                pl.BlockSpec((NPAD, d), lambda i: (0, 0)),
                pl.BlockSpec((NPAD, d), lambda i: (0, 0)),
                pl.BlockSpec((p, d), lambda i: (0, 0)),
                pl.BlockSpec((p, d), lambda i: (0, 0)),
                pl.BlockSpec((NPAD, 2 * NPAD), lambda i: (0, 0)),
            ],
            out_specs=pl.BlockSpec((NPAD, 2 * NPAD), lambda i: (0, 0)),
        ),
        compiler_params=pltpu.CompilerParams(dimension_semantics=("arbitrary",)),
        cost_estimate=cost,
    )(ue, ie, w_u2u, w_i2i, adj_slab)

    return dict(u2u_adj=out[:nu, :nu], i2i_adj=out[:ni, NPAD:NPAD + ni])


# ----------------------------------------------------------------------------
# Pallas kernel 2: fused graph_encoder (one launch, single grid step)
#   - static loop over behaviors, static loop over propagation layers
#   - LightGCN: E_final = mean(E_0 .. E_L),  E_{l+1} = A_b @ E_l
#   - coarse-feedback aggregation fused into the epilogue
#   - one lane-dense (N, 128) output slab:
#       lanes [0 : B*d)              per-behavior final embeddings (concat over b)
#       lanes [B*d : B*d + C*d)      per-feedback-type means (concat over c)
#       lanes [B*d + C*d : 128)      zero padding
# ----------------------------------------------------------------------------
def _encoder_kernel(adj_ref, e0_ref, out_ref, *, n_layers, behavior_type, d):
    num_b = len(behavior_type)
    e_final = []
    for b in range(num_b):                              # static unrolled loop
        a = adj_ref[b]                                  # (N, N)
        e = e0_ref[b]                                   # (N, d)
        acc = e
        for _ in range(n_layers):                       # static unrolled loop
            e = jnp.dot(a, e, preferred_element_type=jnp.float32)
            acc = acc + e
        e_final.append(acc * (1.0 / (n_layers + 1)))

    coarse_ids = sorted(set(behavior_type))
    feedback = []
    for c in coarse_ids:
        members = [e_final[i] for i, t in enumerate(behavior_type) if t == c]
        s = members[0]
        for m in members[1:]:
            s = s + m
        feedback.append(s * (1.0 / len(members)))

    n = adj_ref.shape[1]
    used = (num_b + len(coarse_ids)) * d
    pad = jnp.zeros((n, 128 - used), jnp.float32)
    out_ref[...] = jnp.concatenate(e_final + feedback + [pad], axis=-1)


def graph_encoder(params, multi_u2i_adjs, *, num_users, behavior_type, n_layers, dim):
    b, n, _ = multi_u2i_adjs.shape
    d = dim
    coarse_ids = sorted(set(behavior_type))
    c_num = len(coarse_ids)

    kernel = functools.partial(_encoder_kernel, n_layers=n_layers,
                               behavior_type=tuple(behavior_type), d=d)
    cost = pl.CostEstimate(
        flops=int(b * n_layers * 2 * n * n * d + 4 * n * 128),
        transcendentals=0,
        bytes_accessed=int(4 * (b * n * n + b * n * d + n * 128)))

    slab = pl.pallas_call(
        kernel,
        out_shape=jax.ShapeDtypeStruct((n, 128), jnp.float32),
        grid_spec=pltpu.PrefetchScalarGridSpec(
            num_scalar_prefetch=0,
            grid=(1,),
            in_specs=[
                pl.BlockSpec((b, n, n), lambda i: (0, 0, 0)),
                pl.BlockSpec((b, n, d), lambda i: (0, 0, 0)),
            ],
            out_specs=pl.BlockSpec((n, 128), lambda i: (0, 0)),
        ),
        compiler_params=pltpu.CompilerParams(dimension_semantics=("arbitrary",)),
        cost_estimate=cost,
    )(multi_u2i_adjs, params["behavior_emb"])

    e_behavior = jnp.stack([slab[:, i * d:(i + 1) * d] for i in range(b)])        # (B, N, d)
    e_feedback = jnp.stack([slab[:, (b + i) * d:(b + i + 1) * d] for i in range(c_num)])  # (C, N, d)

    user_each_behavior = e_behavior[:, :num_users, :]
    item_each_behavior = e_behavior[:, num_users:, :]
    user_each_feedback = e_feedback[:, :num_users, :]
    item_each_feedback = e_feedback[:, num_users:, :]
    user_embedding = slab[:num_users, b * d:(b + c_num) * d]                      # (users, C*d)
    item_embedding = slab[num_users:, b * d:(b + c_num) * d]                      # (items, C*d)

    return dict(
        user_embeddings_each_behavior=user_each_behavior,
        item_embeddings_each_behavior=item_each_behavior,
        user_embeddings_each_feedback=user_each_feedback,
        item_embeddings_each_feedback=item_each_feedback,
        user_embedding=user_embedding,
        item_embedding=item_embedding,
    )


# ----------------------------------------------------------------------------
# My_Model.forward equivalent
# ----------------------------------------------------------------------------
def my_model_forward(params, user_embedding, item_embedding, init_adjs,
                     config, num_users):
    if config["graph_learn"]:
        # TODO(synk): sparse top-k graph path (sparse_graph_flag=True) not implemented;
        #             dense epsilon-threshold variant is used here.
        new_adjs = learn_graphs_fused(
            user_embedding, item_embedding,
            params["gl_w_u2u"], params["gl_w_i2i"],
            init_adjs["u2u_adj"], init_adjs["i2i_adj"],
            eps_u=config["epsilon_u2u"], eps_i=config["epsilon_i2i"],
            coe_lambda=config["coe_lambda"])
    else:
        new_adjs = init_adjs

    kinds_of_embeddings = graph_encoder(
        params, init_adjs["multi_u2i_adj"],
        num_users=num_users,
        behavior_type=config["behavior_type"],
        n_layers=config["n_layers"],
        dim=config["dim_each_feedback"],
    )
    # Reference forward discards new_adjs and returns only kinds_of_embeddings;
    # new_adjs is returned here additionally so the learner kernel is not DCE'd.
    return kinds_of_embeddings, new_adjs


# ----------------------------------------------------------------------------
# main
# ----------------------------------------------------------------------------
if __name__ == "__main__":
    cfg = CONFIG
    d = cfg["dim_each_feedback"]
    num_coarse = len(set(cfg["behavior_type"]))
    D = num_coarse * d
    B = len(cfg["behavior_name"])
    N = NUM_USERS + NUM_ITEMS

    key = jax.random.PRNGKey(0)
    k1, k2, k3, k4, k5, k6 = jax.random.split(key, 6)

    # deterministic parameter init (encoder per-behavior node embeddings,
    # graph-learner multi-perspective weight vectors)
    params = dict(
        behavior_emb=0.1 * jax.random.normal(k1, (B, N, d), jnp.float32),
        gl_w_u2u=jax.random.normal(k2, (cfg["num_pers"], D), jnp.float32),
        gl_w_i2i=jax.random.normal(k3, (cfg["num_pers"], D), jnp.float32),
    )

    # "pre-trained / current" embeddings handed to forward()
    user_embedding = 0.1 * jax.random.normal(k4, (NUM_USERS, D), jnp.float32)
    item_embedding = 0.1 * jax.random.normal(k5, (NUM_ITEMS, D), jnp.float32)

    def sym_norm(a):
        deg = jnp.sum(a, axis=-1)
        dinv = jnp.where(deg > 0, 1.0 / jnp.sqrt(deg + 1e-12), 0.0)
        return a * dinv[:, None] * dinv[None, :]

    ks = jax.random.split(k6, B + 2)
    multi = []
    for bb in range(B):
        r = (jax.random.uniform(ks[bb], (NUM_USERS, NUM_ITEMS)) < 0.2).astype(jnp.float32)
        a = jnp.zeros((N, N), jnp.float32)
        a = a.at[:NUM_USERS, NUM_USERS:].set(r)
        a = a.at[NUM_USERS:, :NUM_USERS].set(r.T)
        multi.append(sym_norm(a))
    u2u = sym_norm((jax.random.uniform(ks[B], (NUM_USERS, NUM_USERS)) < 0.2)
                   .astype(jnp.float32) + jnp.eye(NUM_USERS, dtype=jnp.float32))
    i2i = sym_norm((jax.random.uniform(ks[B + 1], (NUM_ITEMS, NUM_ITEMS)) < 0.2)
                   .astype(jnp.float32) + jnp.eye(NUM_ITEMS, dtype=jnp.float32))

    init_adjs = dict(u2u_adj=u2u, i2i_adj=i2i, multi_u2i_adj=jnp.stack(multi))

    kinds, new_adjs = my_model_forward(params, user_embedding, item_embedding,
                                       init_adjs, cfg, NUM_USERS)
    jax.block_until_ready((kinds, new_adjs))
    print("KERNEL_OK")
</pallas_src>

<mosaic_0001>
module attributes {stable_mosaic.version = 11 : i64} {
  func.func @_graph_learner_kernel(%arg0: i32, %arg1: memref<64x32xf32, #tpu.memory_space<vmem>>, %arg2: memref<64x32xf32, #tpu.memory_space<vmem>>, %arg3: memref<4x32xf32, #tpu.memory_space<vmem>>, %arg4: memref<4x32xf32, #tpu.memory_space<vmem>>, %arg5: memref<64x128xf32, #tpu.memory_space<vmem>>, %arg6: memref<64x128xf32, #tpu.memory_space<vmem>>) attributes {dimension_semantics = [#tpu.dimension_semantics<arbitrary>], iteration_bounds = array<i64: 1>, scalar_prefetch = 0 : i64, scratch_operands = 0 : i64, tpu.core_type = #tpu.core_type<tc>, window_params = [{pipeline_mode = #tpu.pipeline_mode<synchronous>, transform_indices = @transform_0, window_bounds = array<i64: 64, 32>}, {pipeline_mode = #tpu.pipeline_mode<synchronous>, transform_indices = @transform_1, window_bounds = array<i64: 64, 32>}, {pipeline_mode = #tpu.pipeline_mode<synchronous>, transform_indices = @transform_2, window_bounds = array<i64: 4, 32>}, {pipeline_mode = #tpu.pipeline_mode<synchronous>, transform_indices = @transform_3, window_bounds = array<i64: 4, 32>}, {pipeline_mode = #tpu.pipeline_mode<synchronous>, transform_indices = @transform_4, window_bounds = array<i64: 64, 128>}, {pipeline_mode = #tpu.pipeline_mode<synchronous>, transform_indices = @transform_5, window_bounds = array<i64: 64, 128>}]} {
    %c0 = arith.constant 0 : index
    %c0_0 = arith.constant 0 : index
    %0 = vector.load %arg1[%c0, %c0_0] : memref<64x32xf32, #tpu.memory_space<vmem>>, vector<64x32xf32>
    %c0_1 = arith.constant 0 : index
    %c0_2 = arith.constant 0 : index
    %1 = vector.load %arg3[%c0_1, %c0_2] : memref<4x32xf32, #tpu.memory_space<vmem>>, vector<4x32xf32>
    %cst = arith.constant 0.000000e+00 : f32
    %2 = vector.broadcast %cst : f32 to vector<64x64xf32>
    %3 = vector.extract_strided_slice %1 {offsets = [0, 0], sizes = [1, 32], strides = [1, 1]} : vector<4x32xf32> to vector<1x32xf32>
    %4 = vector.broadcast %3 : vector<1x32xf32> to vector<64x32xf32>
    %5 = arith.mulf %0, %4 : vector<64x32xf32>
    %6 = arith.mulf %5, %5 : vector<64x32xf32>
    %cst_3 = arith.constant dense<0.000000e+00> : vector<64xf32>
    %7 = vector.multi_reduction <add>, %6, %cst_3 [1] : vector<64x32xf32> to vector<64xf32>
    %8 = vector.shape_cast %7 : vector<64xf32> to vector<64x1xf32>
    %cst_4 = arith.constant 9.99999996E-13 : f32
    %9 = vector.broadcast %cst_4 : f32 to vector<64x1xf32>
    %10 = arith.addf %8, %9 : vector<64x1xf32>
    %11 = math.rsqrt %10 : vector<64x1xf32>
    %12 = vector.broadcast %11 : vector<64x1xf32> to vector<64x32xf32>
    %13 = arith.mulf %5, %12 : vector<64x32xf32>
    %cst_5 = arith.constant dense<0.000000e+00> : vector<64x64xf32>
    %14 = tpu.matmul %13, %13, %cst_5 {dimension_numbers = #tpu.dot_dimension_numbers<[1], [1], [0], [0], [0, 0, 1, 0], [], []>} : vector<64x32xf32>, vector<64x32xf32>, vector<64x64xf32> -> vector<64x64xf32>
    %15 = arith.addf %2, %14 : vector<64x64xf32>
    %16 = vector.extract_strided_slice %1 {offsets = [1, 0], sizes = [1, 32], strides = [1, 1]} : vector<4x32xf32> to vector<1x32xf32>
    %17 = vector.broadcast %16 : vector<1x32xf32> to vector<64x32xf32>
    %18 = arith.mulf %0, %17 : vector<64x32xf32>
    %19 = arith.mulf %18, %18 : vector<64x32xf32>
    %cst_6 = arith.constant dense<0.000000e+00> : vector<64xf32>
    %20 = vector.multi_reduction <add>, %19, %cst_6 [1] : vector<64x32xf32> to vector<64xf32>
    %21 = vector.shape_cast %20 : vector<64xf32> to vector<64x1xf32>
    %cst_7 = arith.constant 9.99999996E-13 : f32
    %22 = vector.broadcast %cst_7 : f32 to vector<64x1xf32>
    %23 = arith.addf %21, %22 : vector<64x1xf32>
    %24 = math.rsqrt %23 : vector<64x1xf32>
    %25 = vector.broadcast %24 : vector<64x1xf32> to vector<64x32xf32>
    %26 = arith.mulf %18, %25 : vector<64x32xf32>
    %cst_8 = arith.constant dense<0.000000e+00> : vector<64x64xf32>
    %27 = tpu.matmul %26, %26, %cst_8 {dimension_numbers = #tpu.dot_dimension_numbers<[1], [1], [0], [0], [0, 0, 1, 0], [], []>} : vector<64x32xf32>, vector<64x32xf32>, vector<64x64xf32> -> vector<64x64xf32>
    %28 = arith.addf %15, %27 : vector<64x64xf32>
    %29 = vector.extract_strided_slice %1 {offsets = [2, 0], sizes = [1, 32], strides = [1, 1]} : vector<4x32xf32> to vector<1x32xf32>
    %30 = vector.broadcast %29 : vector<1x32xf32> to vector<64x32xf32>
    %31 = arith.mulf %0, %30 : vector<64x32xf32>
    %32 = arith.mulf %31, %31 : vector<64x32xf32>
    %cst_9 = arith.constant dense<0.000000e+00> : vector<64xf32>
    %33 = vector.multi_reduction <add>, %32, %cst_9 [1] : vector<64x32xf32> to vector<64xf32>
    %34 = vector.shape_cast %33 : vector<64xf32> to vector<64x1xf32>
    %cst_10 = arith.constant 9.99999996E-13 : f32
    %35 = vector.broadcast %cst_10 : f32 to vector<64x1xf32>
    %36 = arith.addf %34, %35 : vector<64x1xf32>
    %37 = math.rsqrt %36 : vector<64x1xf32>
    %38 = vector.broadcast %37 : vector<64x1xf32> to vector<64x32xf32>
    %39 = arith.mulf %31, %38 : vector<64x32xf32>
    %cst_11 = arith.constant dense<0.000000e+00> : vector<64x64xf32>
    %40 = tpu.matmul %39, %39, %cst_11 {dimension_numbers = #tpu.dot_dimension_numbers<[1], [1], [0], [0], [0, 0, 1, 0], [], []>} : vector<64x32xf32>, vector<64x32xf32>, vector<64x64xf32> -> vector<64x64xf32>
    %41 = arith.addf %28, %40 : vector<64x64xf32>
    %42 = vector.extract_strided_slice %1 {offsets = [3, 0], sizes = [1, 32], strides = [1, 1]} : vector<4x32xf32> to vector<1x32xf32>
    %43 = vector.broadcast %42 : vector<1x32xf32> to vector<64x32xf32>
    %44 = arith.mulf %0, %43 : vector<64x32xf32>
    %45 = arith.mulf %44, %44 : vector<64x32xf32>
    %cst_12 = arith.constant dense<0.000000e+00> : vector<64xf32>
    %46 = vector.multi_reduction <add>, %45, %cst_12 [1] : vector<64x32xf32> to vector<64xf32>
    %47 = vector.shape_cast %46 : vector<64xf32> to vector<64x1xf32>
    %cst_13 = arith.constant 9.99999996E-13 : f32
    %48 = vector.broadcast %cst_13 : f32 to vector<64x1xf32>
    %49 = arith.addf %47, %48 : vector<64x1xf32>
    %50 = math.rsqrt %49 : vector<64x1xf32>
    %51 = vector.broadcast %50 : vector<64x1xf32> to vector<64x32xf32>
    %52 = arith.mulf %44, %51 : vector<64x32xf32>
    %cst_14 = arith.constant dense<0.000000e+00> : vector<64x64xf32>
    %53 = tpu.matmul %52, %52, %cst_14 {dimension_numbers = #tpu.dot_dimension_numbers<[1], [1], [0], [0], [0, 0, 1, 0], [], []>} : vector<64x32xf32>, vector<64x32xf32>, vector<64x64xf32> -> vector<64x64xf32>
    %54 = arith.addf %41, %53 : vector<64x64xf32>
    %cst_15 = arith.constant 2.500000e-01 : f32
    %55 = vector.broadcast %cst_15 : f32 to vector<64x64xf32>
    %56 = arith.mulf %54, %55 : vector<64x64xf32>
    %cst_16 = arith.constant 1.000000e-01 : f32
    %57 = vector.broadcast %cst_16 : f32 to vector<64x64xf32>
    %58 = arith.cmpf ogt, %56, %57 : vector<64x64xf32>
    %cst_17 = arith.constant 0.000000e+00 : f32
    %59 = vector.broadcast %cst_17 : f32 to vector<64x64xf32>
    %60 = arith.select %58, %56, %59 : vector<64x64xi1>, vector<64x64xf32>
    %cst_18 = arith.constant dense<0.000000e+00> : vector<64xf32>
    %61 = vector.multi_reduction <add>, %60, %cst_18 [1] : vector<64x64xf32> to vector<64xf32>
    %62 = vector.shape_cast %61 : vector<64xf32> to vector<64x1xf32>
    %cst_19 = arith.constant 9.99999996E-13 : f32
    %63 = vector.broadcast %cst_19 : f32 to vector<64x1xf32>
    %64 = arith.addf %62, %63 : vector<64x1xf32>
    %65 = vector.broadcast %64 : vector<64x1xf32> to vector<64x64xf32>
    %66 = arith.divf %60, %65 : vector<64x64xf32>
    %c0_20 = arith.constant 0 : index
    %c0_21 = arith.constant 0 : index
    %67 = vector.load %arg2[%c0_20, %c0_21] : memref<64x32xf32, #tpu.memory_space<vmem>>, vector<64x32xf32>
    %c0_22 = arith.constant 0 : index
    %c0_23 = arith.constant 0 : index
    %68 = vector.load %arg4[%c0_22, %c0_23] : memref<4x32xf32, #tpu.memory_space<vmem>>, vector<4x32xf32>
    %cst_24 = arith.constant 0.000000e+00 : f32
    %69 = vector.broadcast %cst_24 : f32 to vector<64x64xf32>
    %70 = vector.extract_strided_slice %68 {offsets = [0, 0], sizes = [1, 32], strides = [1, 1]} : vector<4x32xf32> to vector<1x32xf32>
    %71 = vector.broadcast %70 : vector<1x32xf32> to vector<64x32xf32>
    %72 = arith.mulf %67, %71 : vector<64x32xf32>
    %73 = arith.mulf %72, %72 : vector<64x32xf32>
    %cst_25 = arith.constant dense<0.000000e+00> : vector<64xf32>
    %74 = vector.multi_reduction <add>, %73, %cst_25 [1] : vector<64x32xf32> to vector<64xf32>
    %75 = vector.shape_cast %74 : vector<64xf32> to vector<64x1xf32>
    %cst_26 = arith.constant 9.99999996E-13 : f32
    %76 = vector.broadcast %cst_26 : f32 to vector<64x1xf32>
    %77 = arith.addf %75, %76 : vector<64x1xf32>
    %78 = math.rsqrt %77 : vector<64x1xf32>
    %79 = vector.broadcast %78 : vector<64x1xf32> to vector<64x32xf32>
    %80 = arith.mulf %72, %79 : vector<64x32xf32>
    %cst_27 = arith.constant dense<0.000000e+00> : vector<64x64xf32>
    %81 = tpu.matmul %80, %80, %cst_27 {dimension_numbers = #tpu.dot_dimension_numbers<[1], [1], [0], [0], [0, 0, 1, 0], [], []>} : vector<64x32xf32>, vector<64x32xf32>, vector<64x64xf32> -> vector<64x64xf32>
    %82 = arith.addf %69, %81 : vector<64x64xf32>
    %83 = vector.extract_strided_slice %68 {offsets = [1, 0], sizes = [1, 32], strides = [1, 1]} : vector<4x32xf32> to vector<1x32xf32>
    %84 = vector.broadcast %83 : vector<1x32xf32> to vector<64x32xf32>
    %85 = arith.mulf %67, %84 : vector<64x32xf32>
    %86 = arith.mulf %85, %85 : vector<64x32xf32>
    %cst_28 = arith.constant dense<0.000000e+00> : vector<64xf32>
    %87 = vector.multi_reduction <add>, %86, %cst_28 [1] : vector<64x32xf32> to vector<64xf32>
    %88 = vector.shape_cast %87 : vector<64xf32> to vector<64x1xf32>
    %cst_29 = arith.constant 9.99999996E-13 : f32
    %89 = vector.broadcast %cst_29 : f32 to vector<64x1xf32>
    %90 = arith.addf %88, %89 : vector<64x1xf32>
    %91 = math.rsqrt %90 : vector<64x1xf32>
    %92 = vector.broadcast %91 : vector<64x1xf32> to vector<64x32xf32>
    %93 = arith.mulf %85, %92 : vector<64x32xf32>
    %cst_30 = arith.constant dense<0.000000e+00> : vector<64x64xf32>
    %94 = tpu.matmul %93, %93, %cst_30 {dimension_numbers = #tpu.dot_dimension_numbers<[1], [1], [0], [0], [0, 0, 1, 0], [], []>} : vector<64x32xf32>, vector<64x32xf32>, vector<64x64xf32> -> vector<64x64xf32>
    %95 = arith.addf %82, %94 : vector<64x64xf32>
    %96 = vector.extract_strided_slice %68 {offsets = [2, 0], sizes = [1, 32], strides = [1, 1]} : vector<4x32xf32> to vector<1x32xf32>
    %97 = vector.broadcast %96 : vector<1x32xf32> to vector<64x32xf32>
    %98 = arith.mulf %67, %97 : vector<64x32xf32>
    %99 = arith.mulf %98, %98 : vector<64x32xf32>
    %cst_31 = arith.constant dense<0.000000e+00> : vector<64xf32>
    %100 = vector.multi_reduction <add>, %99, %cst_31 [1] : vector<64x32xf32> to vector<64xf32>
    %101 = vector.shape_cast %100 : vector<64xf32> to vector<64x1xf32>
    %cst_32 = arith.constant 9.99999996E-13 : f32
    %102 = vector.broadcast %cst_32 : f32 to vector<64x1xf32>
    %103 = arith.addf %101, %102 : vector<64x1xf32>
    %104 = math.rsqrt %103 : vector<64x1xf32>
    %105 = vector.broadcast %104 : vector<64x1xf32> to vector<64x32xf32>
    %106 = arith.mulf %98, %105 : vector<64x32xf32>
    %cst_33 = arith.constant dense<0.000000e+00> : vector<64x64xf32>
    %107 = tpu.matmul %106, %106, %cst_33 {dimension_numbers = #tpu.dot_dimension_numbers<[1], [1], [0], [0], [0, 0, 1, 0], [], []>} : vector<64x32xf32>, vector<64x32xf32>, vector<64x64xf32> -> vector<64x64xf32>
    %108 = arith.addf %95, %107 : vector<64x64xf32>
    %109 = vector.extract_strided_slice %68 {offsets = [3, 0], sizes = [1, 32], strides = [1, 1]} : vector<4x32xf32> to vector<1x32xf32>
    %110 = vector.broadcast %109 : vector<1x32xf32> to vector<64x32xf32>
    %111 = arith.mulf %67, %110 : vector<64x32xf32>
    %112 = arith.mulf %111, %111 : vector<64x32xf32>
    %cst_34 = arith.constant dense<0.000000e+00> : vector<64xf32>
    %113 = vector.multi_reduction <add>, %112, %cst_34 [1] : vector<64x32xf32> to vector<64xf32>
    %114 = vector.shape_cast %113 : vector<64xf32> to vector<64x1xf32>
    %cst_35 = arith.constant 9.99999996E-13 : f32
    %115 = vector.broadcast %cst_35 : f32 to vector<64x1xf32>
    %116 = arith.addf %114, %115 : vector<64x1xf32>
    %117 = math.rsqrt %116 : vector<64x1xf32>
    %118 = vector.broadcast %117 : vector<64x1xf32> to vector<64x32xf32>
    %119 = arith.mulf %111, %118 : vector<64x32xf32>
    %cst_36 = arith.constant dense<0.000000e+00> : vector<64x64xf32>
    %120 = tpu.matmul %119, %119, %cst_36 {dimension_numbers = #tpu.dot_dimension_numbers<[1], [1], [0], [0], [0, 0, 1, 0], [], []>} : vector<64x32xf32>, vector<64x32xf32>, vector<64x64xf32> -> vector<64x64xf32>
    %121 = arith.addf %108, %120 : vector<64x64xf32>
    %cst_37 = arith.constant 2.500000e-01 : f32
    %122 = vector.broadcast %cst_37 : f32 to vector<64x64xf32>
    %123 = arith.mulf %121, %122 : vector<64x64xf32>
    %cst_38 = arith.constant 1.000000e-01 : f32
    %124 = vector.broadcast %cst_38 : f32 to vector<64x64xf32>
    %125 = arith.cmpf ogt, %123, %124 : vector<64x64xf32>
    %cst_39 = arith.constant 0.000000e+00 : f32
    %126 = vector.broadcast %cst_39 : f32 to vector<64x64xf32>
    %127 = arith.select %125, %123, %126 : vector<64x64xi1>, vector<64x64xf32>
    %cst_40 = arith.constant dense<0.000000e+00> : vector<64xf32>
    %128 = vector.multi_reduction <add>, %127, %cst_40 [1] : vector<64x64xf32> to vector<64xf32>
    %129 = vector.shape_cast %128 : vector<64xf32> to vector<64x1xf32>
    %cst_41 = arith.constant 9.99999996E-13 : f32
    %130 = vector.broadcast %cst_41 : f32 to vector<64x1xf32>
    %131 = arith.addf %129, %130 : vector<64x1xf32>
    %132 = vector.broadcast %131 : vector<64x1xf32> to vector<64x64xf32>
    %133 = arith.divf %127, %132 : vector<64x64xf32>
    %134 = tpu.concatenate %66, %133 in 1 : vector<64x64xf32>, vector<64x64xf32> -> vector<64x128xf32>
    %c0_42 = arith.constant 0 : index
    %c0_43 = arith.constant 0 : index
    %135 = vector.load %arg5[%c0_42, %c0_43] : memref<64x128xf32, #tpu.memory_space<vmem>>, vector<64x128xf32>
    %cst_44 = arith.constant 5.000000e-01 : f32
    %136 = vector.broadcast %cst_44 : f32 to vector<64x128xf32>
    %137 = arith.mulf %136, %135 : vector<64x128xf32>
    %cst_45 = arith.constant 5.000000e-01 : f32
    %138 = vector.broadcast %cst_45 : f32 to vector<64x128xf32>
    %139 = arith.mulf %138, %134 : vector<64x128xf32>
    %140 = arith.addf %137, %139 : vector<64x128xf32>
    %c0_46 = arith.constant 0 : index
    %c0_47 = arith.constant 0 : index
    %141 = vector.load %arg6[%c0_46, %c0_47] : memref<64x128xf32, #tpu.memory_space<vmem>>, vector<64x128xf32>
    tpu.vector_store %arg6[%c0_46, %c0_47], %140 {strides = array<i32>} : memref<64x128xf32, #tpu.memory_space<vmem>>, vector<64x128xf32>,
    return
  }
  func.func @transform_0(%arg0: i32) -> (i32, i32) {
    %c0_i32 = arith.constant 0 : i32
    %c0_i32_0 = arith.constant 0 : i32
    %c0_i32_1 = arith.constant 0 : i32
    return %c0_i32, %c0_i32_0 : i32, i32
  }
  func.func @transform_1(%arg0: i32) -> (i32, i32) {
    %c0_i32 = arith.constant 0 : i32
    %c0_i32_0 = arith.constant 0 : i32
    %c0_i32_1 = arith.constant 0 : i32
    return %c0_i32, %c0_i32_0 : i32, i32
  }
  func.func @transform_2(%arg0: i32) -> (i32, i32) {
    %c0_i32 = arith.constant 0 : i32
    %c0_i32_0 = arith.constant 0 : i32
    %c0_i32_1 = arith.constant 0 : i32
    return %c0_i32, %c0_i32_0 : i32, i32
  }
  func.func @transform_3(%arg0: i32) -> (i32, i32) {
    %c0_i32 = arith.constant 0 : i32
    %c0_i32_0 = arith.constant 0 : i32
    %c0_i32_1 = arith.constant 0 : i32
    return %c0_i32, %c0_i32_0 : i32, i32
  }
  func.func @transform_4(%arg0: i32) -> (i32, i32) {
    %c0_i32 = arith.constant 0 : i32
    %c0_i32_0 = arith.constant 0 : i32
    %c0_i32_1 = arith.constant 0 : i32
    return %c0_i32, %c0_i32_0 : i32, i32
  }
  func.func @transform_5(%arg0: i32) -> (i32, i32) {
    %c0_i32 = arith.constant 0 : i32
    %c0_i32_0 = arith.constant 0 : i32
    %c0_i32_1 = arith.constant 0 : i32
    return %c0_i32, %c0_i32_0 : i32, i32
  }
}

</mosaic_0001>

<bundles_post_ra>
// kernel: tpu_custom_call.1
= control target key start
LH: loop header
LB: loop body
LE: loop exit
PB: predicated region body
PF: predicated region fallthrough
CT: control target
= control target key end

     0   :  { %v30_v0 = vlaneseq  ;;  %s3989_s0 = inlined_call_operand.vmem [shape: f32[64,32], index: 0, kind: input, shape index: {}]   ;;  %s3990_s1 = inlined_call_operand.vmem [shape: f32[64,32], index: 1, kind: input, shape index: {}]   ;;  %s3991_s2 = inlined_call_operand.vmem [shape: f32[4,32], index: 2, kind: input, shape index: {}]   ;;  %s3992_s3 = inlined_call_operand.vmem [shape: f32[4,32], index: 3, kind: input, shape index: {}]   ;;  %s3993_s4 = inlined_call_operand.vmem [shape: f32[64,128], index: 4, kind: input, shape index: {}]   ;;  %s3994_s5 = inlined_call_operand.hbm [shape: f32[64,128], index: 5, kind: output, shape index: {}]  }
   0x1   :  { %v2836_v2 = vld [vmem:[%s3992_s3] sm:$0xf]  ;;  %v2842_v4 = vld [vmem:[%s3990_s1 + $0x10] sm:$0xff]  ;;  %v2852_v6 = vld [vmem:[%s3990_s1 + $0x18] sm:$0xff] }
   0x2   :  { %v2831_v1 = vshrl.u32 %v30_v0, 7  ;;  %v2847_v5 = vld [vmem:[%s3990_s1] sm:$0xff]  ;;  %v2857_v7 = vld [vmem:[%s3990_s1 + $0x8] sm:$0xff] }
   0x3   :  { %v2862_v8 = vld [vmem:[%s3990_s1 + $0x28] sm:$0xff]  ;;  %v2871_v11 = vld [vmem:[%s3990_s1 + $0x20] sm:$0xff] }
   0x4   :  { %v101_v3 = vsub.s32 1, %v2831_v1  ;;  %v632_v9 = vsub.s32 3, %v2831_v1  ;;  %v2876_v12 = vld [vmem:[%s3991_s2] sm:$0xf] }
   0x6   :  { %v988_v10 = vrot.slane %v2836_v2, %v101_v3 }
   0x7   :  { %10 = vsyncpa [#allocation3], 0  ;;  %v2879_v13 = vrot.slane %v2836_v2, %v632_v9  ;;  %v2882_v14 = vrot.slane %v2876_v12, %v632_v9  ;;  %vm50_vm0 = vcmask 261120   ;;  %v3995_v21 = vsub.s32 0, %v2831_v1  ;;  %v2914_v26 = vld [vmem:[%s3990_s1 + $0x38] sm:$0xff]  ;;  %v2919_v27 = vld [vmem:[%s3990_s1 + $0x30] sm:$0xff] }
   0x8   :  { %v2885_v15 = vmul.f32 %v988_v10, %v2842_v4  ;;  %v2888_v16 = vmul.f32 %v988_v10, %v2847_v5  ;;  %v2891_v17 = vmul.f32 %v988_v10, %v2852_v6  ;;  %v2894_v18 = vmul.f32 %v988_v10, %v2857_v7  ;;  %v2995_v63 = vld [vmem:[%s3989_s0 + $0x8] sm:$0xff]  ;;  %v3000_v0 = vld [vmem:[%s3989_s0] sm:$0xff]  ;;  %vm3390_vm1 = vmpackc.low %vm50_vm0, %vm50_vm0  ;;  %s2798_s14 = smov [#allocation2]  }
   0x9   :  { %v2897_v19 = vmul.f32 %v988_v10, %v2862_v8  ;;  %v2900_v20 = vmul.f32 %v988_v10, %v2871_v11  ;;  %v2924_v30 = vmul.f32 %v988_v10, %v2914_v26  ;;  %v2927_v31 = vmul.f32 %v988_v10, %v2919_v27  ;;  %s1878_s15 = sshll.u32 %s2798_s14, 4  ;;  %s1879_s15 = int_to_ptr.vmem [resolvable:$true] %s1878_s15 }
   0xa   :  { %v999_v22 = vmul.f32 %v2885_v15, %v2885_v15  ;;  %v997_v23 = vmul.f32 %v2888_v16, %v2888_v16  ;;  %v1000_v24 = vmul.f32 %v2891_v17, %v2891_v17  ;;  %v998_v25 = vmul.f32 %v2894_v18, %v2894_v18  ;;  %p2778_p1 = scmp.lt.s32.totalorder %s1879_s15, %s1879_s15 }
   0xb   :  { %v920_v32 = vrot.slane %v2836_v2, %v3995_v21  ;;  %v1002_v35 = vmul.f32 %v2897_v19, %v2897_v19  ;;  %v1001_v36 = vmul.f32 %v2900_v20, %v2900_v20  ;;  %v1004_v37 = vmul.f32 %v2924_v30, %v2924_v30 }
   0xc   :  { %v1011_v28 = vsel %vm50_vm0, %v999_v22, 0.0  ;;  %v1005_v29 = vsel %vm50_vm0, %v997_v23, 0.0  ;;  %v1014_v33 = vsel %vm50_vm0, %v1000_v24, 0.0  ;;  %v1008_v34 = vsel %vm50_vm0, %v998_v25, 0.0 }
   0xd   :  { %1012 = vadd.xlane.f32.xlu1 %v1011_v28  ;;  %1006 = vadd.xlane.f32.xlu0 %v1005_v29  ;;  %v1003_v38 = vmul.f32 %v2927_v31, %v2927_v31  ;;  %v1020_v39 = vsel %vm50_vm0, %v1002_v35, 0.0  ;;  %v1017_v40 = vsel %vm50_vm0, %v1001_v36, 0.0  ;;  %v2945_v41 = vmul.f32 %v920_v32, %v2857_v7  ;;  %v3044_v36 = vld [vmem:[%s3989_s0 + $0x18] sm:$0xff] }
   0xe   :  { %v2948_v42 = vmul.f32 %v920_v32, %v2847_v5  ;;  %v1026_v43 = vsel %vm50_vm0, %v1004_v37, 0.0  ;;  %v2957_v47 = vmul.f32 %v920_v32, %v2852_v6  ;;  %v2960_v48 = vmul.f32 %v920_v32, %v2842_v4 }
   0xf   :  { %v1023_v44 = vsel %vm50_vm0, %v1003_v38, 0.0  ;;  %v930_v45 = vmul.f32 %v2945_v41, %v2945_v41  ;;  %v2963_v49 = vmul.f32 %v920_v32, %v2862_v8  ;;  %v2966_v50 = vmul.f32 %v920_v32, %v2871_v11 }
  0x10   :  { %v929_v46 = vmul.f32 %v2948_v42, %v2948_v42  ;;  %v932_v53 = vmul.f32 %v2957_v47, %v2957_v47  ;;  %v931_v54 = vmul.f32 %v2960_v48, %v2960_v48  ;;  %v2975_v55 = vmul.f32 %v920_v32, %v2914_v26 }
  0x11   :  { %1015 = vadd.xlane.f32.xlu1 %v1014_v33  ;;  %1009 = vadd.xlane.f32.xlu0 %v1008_v34  ;;  %v940_v51 = vsel %vm50_vm0, %v930_v45, 0.0  ;;  %v2978_v56 = vmul.f32 %v920_v32, %v2919_v27  ;;  %v2983_v57 = vrot.slane %v2876_v12, %v101_v3  ;;  %v427_v58 = vsub.s32 2, %v2831_v1 }
  0x12   :  { %v937_v52 = vsel %vm50_vm0, %v929_v46, 0.0  ;;  %4017 = vst [vmem:[#allocation5_spill] sm:$0xff] %v2975_v55  ;;  %v946_v59 = vsel %vm50_vm0, %v932_v53, 0.0  ;;  %v943_v60 = vsel %vm50_vm0, %v931_v54, 0.0  ;;  %v934_v61 = vmul.f32 %v2963_v49, %v2963_v49 }
  0x13   :  { %4018 = vst [vmem:[#allocation6_spill] sm:$0xff] %v2978_v56  ;;  %v933_v62 = vmul.f32 %v2966_v50, %v2966_v50  ;;  %v936_v3 = vmul.f32 %v2975_v55, %v2975_v55  ;;  %v3006_v9 = vmul.f32 %v2879_v13, %v2857_v7  ;;  %v3010_v10 = vmul.f32 %v2879_v13, %v2847_v5 }
  0x14   :  { %v935_v22 = vmul.f32 %v2978_v56, %v2978_v56  ;;  %v3015_v23 = vrot.slane %v2836_v2, %v427_v58  ;;  %v952_v24 = vsel %vm50_vm0, %v934_v61, 0.0  ;;  %v3021_v28 = vmul.f32 %v2983_v57, %v2995_v63 }
  0x15   :  { %1021 = vadd.xlane.f32.xlu1 %v1020_v39  ;;  %1018 = vadd.xlane.f32.xlu0 %v1017_v40  ;;  %4019 = vst [vmem:[#allocation7_spill] sm:$0xff] %v3006_v9  ;;  %v949_v25 = vsel %vm50_vm0, %v933_v62, 0.0  ;;  %v3025_v29 = vmul.f32 %v2983_v57, %v3000_v0  ;;  %v3029_v32 = vmul.f32 %v2879_v13, %v2852_v6  ;;  %v958_v33 = vsel %vm50_vm0, %v936_v3, 0.0 }
  0x16   :  { %v955_v2 = vsel %vm50_vm0, %v935_v22, 0.0  ;;  %v3035_v34 = vmul.f32 %v3015_v23, %v2857_v7  ;;  %v3039_v35 = vmul.f32 %v3015_v23, %v2847_v5  ;;  %v3048_v37 = vmul.f32 %v2879_v13, %v2842_v4  ;;  %v3057_v5 = vld [vmem:[%s3989_s0 + $0x10] sm:$0xff] }
  0x17   :  { %v112_v38 = vmul.f32 %v3021_v28, %v3021_v28  ;;  %v111_v7 = vmul.f32 %v3025_v29, %v3025_v29  ;;  %v3061_v39 = vmul.f32 %v2879_v13, %v2862_v8  ;;  %v3065_v40 = vmul.f32 %v2879_v13, %v2871_v11 }
  0x18   :  { %4020 = vst [vmem:[#allocation8_spill] sm:$0xff] %v3035_v34  ;;  %4021 = vst [vmem:[#allocation9_spill] sm:$0xff] %v3039_v35  ;;  %v3076_v45 = vmul.f32 %v2983_v57, %v3057_v5  ;;  %v3080_v46 = vmul.f32 %v2879_v13, %v2914_v26  ;;  %v1324_v53 = vmul.f32 %v3035_v34, %v3035_v34  ;;  %vm859_vm2 = vcmask 523264  }
  0x19   :  { %1027 = vadd.xlane.f32.xlu1 %v1026_v43  ;;  %1024 = vadd.xlane.f32.xlu0 %v1023_v44  ;;  %4022 = vst [vmem:[#allocation10_spill] sm:$0xff] %v3061_v39  ;;  %v3069_v43 = vmul.f32 %v2983_v57, %v3044_v36  ;;  %v3072_v44 = vrot.slane %v2876_v12, %v427_v58 }
  0x1a   :  { %4023 = vst [vmem:[#allocation11_spill] sm:$0xff] %v3080_v46  ;;  %v1323_v54 = vmul.f32 %v3039_v35, %v3039_v35  ;;  %v3090_v58 = vmul.f32 %v2879_v13, %v2919_v27  ;;  %v113_v13 = vmul.f32 %v3076_v45, %v3076_v45  ;;  %v3110_v3 = vmul.f32 %v3015_v23, %v2842_v4 }
  0x1b   :  { %v3100_v61 = vmul.f32 %v3072_v44, %v2995_v63  ;;  %v3104_v62 = vmul.f32 %v3072_v44, %v3000_v0 }
  0x1c   :  { %4024 = vst [vmem:[#allocation12_spill] sm:$0xff] %v3090_v58  ;;  %4026 = vst [vmem:[#allocation14_spill] sm:$0xff] %v3110_v3  ;;  %v1331_v22 = vsel %vm50_vm0, %v1323_v54, 0.0  ;;  %v3148_v54 = vmul.f32 %v2882_v14, %v3044_v36 }
  0x1d   :  { %941 = vadd.xlane.f32.xlu1 %v940_v51  ;;  %938 = vadd.xlane.f32.xlu0 %v937_v52  ;;  %v122_v51 = vsel %vm50_vm0, %v112_v38, 0.0  ;;  %v119_v52 = vsel %vm50_vm0, %v111_v7, 0.0  ;;  %v1325_v38 = vmul.f32 %v3110_v3, %v3110_v3 }
  0x1e   :  { %4030 = vst [vmem:[#allocation18_spill] sm:$0xff] %v3148_v54 }
  0x1f   :  { %v1337_v34 = vsel %vm50_vm0, %v1325_v38, 0.0 }
  0x21   :  { %947 = vadd.xlane.f32.xlu1 %v946_v59  ;;  %944 = vadd.xlane.f32.xlu0 %v943_v60  ;;  %v114_v59 = vmul.f32 %v3069_v43, %v3069_v43  ;;  %v3096_v60 = vmul.f32 %v3015_v23, %v2852_v6  ;;  %v1334_v6 = vsel %vm50_vm0, %v1324_v53, 0.0  ;;  %v3144_v53 = vmul.f32 %v2882_v14, %v3000_v0 }
  0x23   :  { %4025 = vst [vmem:[#allocation13_spill] sm:$0xff] %v3096_v60  ;;  %v1326_v4 = vmul.f32 %v3096_v60, %v3096_v60  ;;  %4029 = vst [vmem:[#allocation17_spill] sm:$0xff] %v3144_v53  ;;  %v3170_v60 = vmul.f32 %v3015_v23, %v2862_v8  ;;  %v3188_v8 = vld [vmem:[%s3989_s0 + $0x30] sm:$0xff] }
  0x24   :  { %v3200_v38 = vmul.f32 %v2983_v57, %v3188_v8 }
  0x25   :  { %953 = vadd.xlane.f32.xlu1 %v952_v24  ;;  %950 = vadd.xlane.f32.xlu0 %v949_v25  ;;  %v3117_v24 = vld [vmem:[%s3989_s0 + $0x28] sm:$0xff]  ;;  %v3122_v25 = vld [vmem:[%s3989_s0 + $0x20] sm:$0xff]  ;;  %v1340_v21 = vsel %vm50_vm0, %v1326_v4, 0.0  ;;  %4034 = vst [vmem:[#allocation22_spill] sm:$0xff] %v3170_v60  ;;  %v3192_v4 = vmul.f32 %v2882_v14, %v3188_v8 }
  0x26   :  { %v3132_v7 = vmul.f32 %v2983_v57, %v3117_v24 }
  0x27   :  { %4037 = vst [vmem:[#allocation25_spill] sm:$0xff] %v3192_v4 }
  0x28   :  { %v116_v35 = vmul.f32 %v3132_v7, %v3132_v7 }
  0x29   :  { %959 = vadd.xlane.f32.xlu1 %v958_v33  ;;  %956 = vadd.xlane.f32.xlu0 %v955_v2  ;;  %v128_v33 = vsel %vm50_vm0, %v114_v59, 0.0  ;;  %v125_v2 = vsel %vm50_vm0, %v113_v13, 0.0  ;;  %v3152_v59 = vmul.f32 %v2882_v14, %v3057_v5  ;;  %v3156_v13 = vmul.f32 %v2882_v14, %v3117_v24 }
  0x2b   :  { %4031 = vst [vmem:[#allocation19_spill] sm:$0xff] %v3152_v59  ;;  %4032 = vst [vmem:[#allocation20_spill] sm:$0xff] %v3156_v13 }
  0x2d   :  { %123 = vadd.xlane.f32.xlu1 %v122_v51  ;;  %120 = vadd.xlane.f32.xlu0 %v119_v52  ;;  %v3136_v51 = vmul.f32 %v2983_v57, %v3122_v25  ;;  %v3140_v52 = vmul.f32 %v2882_v14, %v2995_v63 }
  0x2f   :  { %4027 = vst [vmem:[#allocation15_spill] sm:$0xff] %v3136_v51  ;;  %4028 = vst [vmem:[#allocation16_spill] sm:$0xff] %v3140_v52  ;;  %v115_v55 = vmul.f32 %v3136_v51, %v3136_v51  ;;  %v1328_v51 = vmul.f32 %v3170_v60, %v3170_v60 }
  0x31   :  { %1335 = vadd.xlane.f32.xlu1 %v1334_v6  ;;  %1332 = vadd.xlane.f32.xlu0 %v1331_v22  ;;  %v3160_v6 = vmul.f32 %v2882_v14, %v3122_v25  ;;  %v3165_v22 = vld [vmem:[%s3989_s0 + $0x38] sm:$0xff]  ;;  %v131_v56 = vsel %vm50_vm0, %v115_v55, 0.0  ;;  %v1346_v55 = vsel %vm50_vm0, %v1328_v51, 0.0  ;;  %s2797_s0 = smov 64  }
  0x32   :  { %v3174_v3 = vmul.f32 %v2882_v14, %v3165_v22 }
  0x33   :  { %4033 = vst [vmem:[#allocation21_spill] sm:$0xff] %v3160_v6 }
  0x34   :  { %4035 = vst [vmem:[#allocation23_spill] sm:$0xff] %v3174_v3 }
  0x35   :  { %129 = vadd.xlane.f32.xlu1 %v128_v33  ;;  %126 = vadd.xlane.f32.xlu0 %v125_v2  ;;  %v3183_v33 = vmul.f32 %v3015_v23, %v2871_v11  ;;  %v3196_v2 = vmul.f32 %v2983_v57, %v3165_v22  ;;  %v134_v11 = vsel %vm50_vm0, %v116_v35, 0.0  ;;  %v4038_v57 = vsub.s32 0, %v2831_v1 }
  0x37   :  { %4036 = vst [vmem:[#allocation24_spill] sm:$0xff] %v3183_v33  ;;  %v1327_v14 = vmul.f32 %v3183_v33, %v3183_v33  ;;  %v33_v35 = vrot.slane %v2876_v12, %v4038_v57  ;;  %v117_v33 = vmul.f32 %v3200_v38, %v3200_v38 }
  0x39   :  { %1341 = vadd.xlane.f32.xlu1 %v1340_v21  ;;  %1338 = vadd.xlane.f32.xlu0 %v1337_v34  ;;  %v118_v21 = vmul.f32 %v3196_v2, %v3196_v2  ;;  %v3212_v34 = vmul.f32 %v3015_v23, %v2914_v26  ;;  %v1343_v60 = vsel %vm50_vm0, %v1327_v14, 0.0  ;;  %v137_v12 = vsel %vm50_vm0, %v117_v33, 0.0 }
  0x3a   :  { %v3235_v14 = vmul.f32 %v33_v35, %v3000_v0  ;;  %v3247_v0 = vmul.f32 %v33_v35, %v3057_v5 }
  0x3b   :  { %v140_v26 = vsel %vm50_vm0, %v118_v21, 0.0  ;;  %v1330_v1 = vmul.f32 %v3212_v34, %v3212_v34 }
  0x3c   :  { %v42_v33 = vmul.f32 %v3235_v14, %v3235_v14 }
  0x3d   :  { %135 = vadd.xlane.f32.xlu1 %v134_v11  ;;  %132 = vadd.xlane.f32.xlu0 %v131_v56  ;;  %v3223_v56 = vmul.f32 %v3015_v23, %v2919_v27  ;;  %v3232_v11 = vmul.f32 %v33_v35, %v2995_v63  ;;  %v1352_v27 = vsel %vm50_vm0, %v1330_v1, 0.0  ;;  %v3244_v63 = vmul.f32 %v33_v35, %v3044_v36 }
  0x3e   :  { %v51_v57 = vsel %vm50_vm0, %v42_v33, 0.0  ;;  %v1531_v33 = vmul.f32 %v3029_v32, %v3029_v32 }
  0x3f   :  { %v1329_v51 = vmul.f32 %v3223_v56, %v3223_v56  ;;  %v45_v1 = vmul.f32 %v3244_v63, %v3244_v63 }
  0x41   :  { %1347 = vadd.xlane.f32.xlu1 %v1346_v55  ;;  %1344 = vadd.xlane.f32.xlu0 %v1343_v60  ;;  %v1349_v23 = vsel %vm50_vm0, %v1329_v51, 0.0  ;;  %v43_v60 = vmul.f32 %v3232_v11, %v3232_v11  ;;  %v1529_v55 = vmul.f32 %v3006_v9, %v3006_v9  ;;  %v3271_v9 = vmul.f32 %v33_v35, %v3122_v25 }
  0x43   :  { %v54_v21 = vsel %vm50_vm0, %v43_v60, 0.0  ;;  %v1539_v51 = vsel %vm50_vm0, %v1529_v55, 0.0  ;;  %v1545_v55 = vsel %vm50_vm0, %v1531_v33, 0.0  ;;  %v1533_v33 = vmul.f32 %v3061_v39, %v3061_v39 }
  0x45   :  { %141 = vadd.xlane.f32.xlu1 %v140_v26  ;;  %138 = vadd.xlane.f32.xlu0 %v137_v12  ;;  %v1528_v26 = vmul.f32 %v3010_v10, %v3010_v10  ;;  %v44_v12 = vmul.f32 %v3247_v0, %v3247_v0 }
  0x47   :  { %v57_v60 = vsel %vm50_vm0, %v44_v12, 0.0  ;;  %v46_v12 = vmul.f32 %v3271_v9, %v3271_v9 }
  0x49   :  { %1353 = vadd.xlane.f32.xlu1 %v1352_v27  ;;  %1350 = vadd.xlane.f32.xlu0 %v1349_v23  ;;  %v1536_v27 = vsel %vm50_vm0, %v1528_v26, 0.0  ;;  %v60_v23 = vsel %vm50_vm0, %v45_v1, 0.0 }
  0x4d   :  { %55 = vadd.xlane.f32.xlu1 %v54_v21  ;;  %52 = vadd.xlane.f32.xlu0 %v51_v57  ;;  %v1530_v21 = vmul.f32 %v3048_v37, %v3048_v37  ;;  %v3268_v57 = vmul.f32 %v33_v35, %v3117_v24 }
  0x4f   :  { %v1542_v26 = vsel %vm50_vm0, %v1530_v21, 0.0  ;;  %v47_v1 = vmul.f32 %v3268_v57, %v3268_v57  ;;  %v1532_v21 = vmul.f32 %v3065_v40, %v3065_v40 }
  0x51   :  { %1540 = vadd.xlane.f32.xlu1 %v1539_v51  ;;  %1537 = vadd.xlane.f32.xlu0 %v1536_v27  ;;  %v3280_v51 = vmul.f32 %v33_v35, %v3165_v22  ;;  %v3283_v27 = vmul.f32 %v33_v35, %v3188_v8 }
  0x53   :  { %v49_v35 = vmul.f32 %v3280_v51, %v3280_v51 }
  0x55   :  { %61 = vadd.xlane.f32.xlu1 %v60_v23  ;;  %58 = vadd.xlane.f32.xlu0 %v57_v60  ;;  %v66_v23 = vsel %vm50_vm0, %v47_v1, 0.0  ;;  %v63_v60 = vsel %vm50_vm0, %v46_v12, 0.0  ;;  %v48_v1 = vmul.f32 %v3283_v27, %v3283_v27  ;;  %v72_v12 = vsel %vm50_vm0, %v49_v35, 0.0 }
  0x56   :  { %v438_v35 = vmul.f32 %v3100_v61, %v3100_v61 }
  0x57   :  { %v69_v39 = vsel %vm50_vm0, %v48_v1, 0.0  ;;  %v437_v1 = vmul.f32 %v3104_v62, %v3104_v62 }
  0x59   :  { %1546 = vadd.xlane.f32.xlu1 %v1545_v55  ;;  %1543 = vadd.xlane.f32.xlu0 %v1542_v26  ;;  %v1551_v55 = vsel %vm50_vm0, %v1533_v33, 0.0  ;;  %v1548_v26 = vsel %vm50_vm0, %v1532_v21, 0.0  ;;  %v3305_v33 = vmul.f32 %v3072_v44, %v3044_v36  ;;  %v3309_v21 = vmul.f32 %v3072_v44, %v3057_v5 }
  0x5a   :  { %v3319_v36 = vmul.f32 %v3072_v44, %v3117_v24  ;;  %v3323_v5 = vmul.f32 %v3072_v44, %v3122_v25 }
  0x5c   :  { %v442_v24 = vmul.f32 %v3319_v36, %v3319_v36 }
  0x5d   :  { %67 = vadd.xlane.f32.xlu1 %v66_v23  ;;  %64 = vadd.xlane.f32.xlu0 %v63_v60  ;;  %v1535_v23 = vmul.f32 %v3080_v46, %v3080_v46  ;;  %v1534_v60 = vmul.f32 %v3090_v58, %v3090_v58 }
  0x61   :  { %1552 = vadd.xlane.f32.xlu1 %v1551_v55  ;;  %1549 = vadd.xlane.f32.xlu0 %v1548_v26  ;;  %v1557_v55 = vsel %vm50_vm0, %v1535_v23, 0.0  ;;  %v1554_v26 = vsel %vm50_vm0, %v1534_v60, 0.0  ;;  %v440_v23 = vmul.f32 %v3305_v33, %v3305_v33  ;;  %v439_v60 = vmul.f32 %v3309_v21, %v3309_v21 }
  0x63   :  { %v454_v25 = vsel %vm50_vm0, %v440_v23, 0.0 }
  0x65   :  { %73 = vadd.xlane.f32.xlu1 %v72_v12  ;;  %70 = vadd.xlane.f32.xlu0 %v69_v39  ;;  %v448_v39 = vsel %vm50_vm0, %v438_v35, 0.0  ;;  %v445_v12 = vsel %vm50_vm0, %v437_v1, 0.0  ;;  %v3339_v35 = vmul.f32 %v3072_v44, %v3165_v22  ;;  %v3343_v1 = vmul.f32 %v3072_v44, %v3188_v8 }
  0x66   :  { %v643_v44 = vmul.f32 %v3140_v52, %v3140_v52  ;;  %v642_v8 = vmul.f32 %v3144_v53, %v3144_v53 }
  0x67   :  { %v444_v46 = vmul.f32 %v3339_v35, %v3339_v35  ;;  %v443_v23 = vmul.f32 %v3343_v1, %v3343_v1 }
  0x69   :  { %1558 = vadd.xlane.f32.xlu1 %v1557_v55  ;;  %1555 = vadd.xlane.f32.xlu0 %v1554_v26  ;;  %v441_v55 = vmul.f32 %v3323_v5, %v3323_v5  ;;  %v451_v26 = vsel %vm50_vm0, %v439_v60, 0.0  ;;  %v466_v22 = vsel %vm50_vm0, %v444_v46, 0.0  ;;  %v463_v60 = vsel %vm50_vm0, %v443_v23, 0.0 }
  0x6a   :  { %v644_v46 = vmul.f32 %v3152_v59, %v3152_v59  ;;  %v646_v23 = vmul.f32 %v3160_v6, %v3160_v6 }
  0x6d   :  { %449 = vadd.xlane.f32.xlu1 %v448_v39  ;;  %446 = vadd.xlane.f32.xlu0 %v445_v12  ;;  %v460_v39 = vsel %vm50_vm0, %v442_v24, 0.0  ;;  %v457_v12 = vsel %vm50_vm0, %v441_v55, 0.0  ;;  %v653_v24 = vsel %vm50_vm0, %v643_v44, 0.0  ;;  %v650_v55 = vsel %vm50_vm0, %v642_v8, 0.0 }
  0x6e   :  { %v649_v44 = vmul.f32 %v3174_v3, %v3174_v3  ;;  %v648_v8 = vmul.f32 %v3192_v4, %v3192_v4 }
  0x71   :  { %455 = vadd.xlane.f32.xlu1 %v454_v25  ;;  %452 = vadd.xlane.f32.xlu0 %v451_v26  ;;  %v645_v25 = vmul.f32 %v3148_v54, %v3148_v54 }
  0x73   :  { %v659_v26 = vsel %vm50_vm0, %v645_v25, 0.0 }
  0x75   :  { %461 = vadd.xlane.f32.xlu1 %v460_v39  ;;  %458 = vadd.xlane.f32.xlu0 %v457_v12  ;;  %v656_v39 = vsel %vm50_vm0, %v644_v46, 0.0  ;;  %v647_v12 = vmul.f32 %v3156_v13, %v3156_v13 }
  0x79   :  { %467 = vadd.xlane.f32.xlu1 %v466_v22  ;;  %464 = vadd.xlane.f32.xlu0 %v463_v60  ;;  %v665_v22 = vsel %vm50_vm0, %v647_v12, 0.0  ;;  %v662_v60 = vsel %vm50_vm0, %v646_v23, 0.0 }
  0x7d   :  { %654 = vadd.xlane.f32.xlu1 %v653_v24  ;;  %651 = vadd.xlane.f32.xlu0 %v650_v55  ;;  %v671_v24 = vsel %vm50_vm0, %v649_v44, 0.0  ;;  %v668_v55 = vsel %vm50_vm0, %v648_v8, 0.0 }
  0x81   :  { %660 = vadd.xlane.f32.xlu1 %v659_v26  ;;  %657 = vadd.xlane.f32.xlu0 %v656_v39 }
  0x85   :  { %666 = vadd.xlane.f32.xlu1 %v665_v22  ;;  %663 = vadd.xlane.f32.xlu0 %v662_v60 }
  0x89   :  { %672 = vadd.xlane.f32.xlu1 %v671_v24  ;;  %669 = vadd.xlane.f32.xlu0 %v668_v55 }
  0x9a   :  { %v1013_v25 = vpop.xlane.xlu1 %1012  ;;  %v1007_v46 = vpop.xlane.xlu0 %1006 }
  0x9b   :  { %v1031_v26 = vadd.f32 1e-12, %v1013_v25  ;;  %v1029_v39 = vadd.f32 1e-12, %v1007_v46 }
  0x9d   :  { %2613 = vrsqrt.f32 %v1031_v26 }
  0x9e   :  { %2615 = vrsqrt.f32 %v1029_v39  ;;  %v1016_v12 = vpop.xlane.xlu1 %1015  ;;  %v1010_v23 = vpop.xlane.xlu0 %1009 }
  0x9f   :  { %v1032_v3 = vadd.f32 1e-12, %v1016_v12  ;;  %v1030_v13 = vadd.f32 1e-12, %v1010_v23 }
  0xa1   :  { %2617 = vrsqrt.f32 %v1032_v3 }
  0xa2   :  { %2619 = vrsqrt.f32 %v1030_v13  ;;  %v1022_v22 = vpop.xlane.xlu1 %1021  ;;  %v1019_v60 = vpop.xlane.xlu0 %1018 }
  0xa3   :  { %v1034_v4 = vadd.f32 1e-12, %v1022_v22  ;;  %v1033_v44 = vadd.f32 1e-12, %v1019_v60 }
  0xa5   :  { %2621 = vrsqrt.f32 %v1034_v4 }
  0xa6   :  { %2623 = vrsqrt.f32 %v1033_v44  ;;  %v1028_v8 = vpop.xlane.xlu1 %1027  ;;  %v1025_v24 = vpop.xlane.xlu0 %1024 }
  0xa7   :  { %v2614_v55 = vpop.eup %2613  ;;  %v1036_v25 = vadd.f32 1e-12, %v1028_v8  ;;  %v1035_v26 = vadd.f32 1e-12, %v1025_v24 }
  0xa8   :  { %v2616_v6 = vpop.eup %2615  ;;  %v3380_v3 = vmul.f32 %v2614_v55, %v2885_v15 }
  0xa9   :  { %v1045_v46 = vmul.f32 %v2616_v6, %v2888_v16  ;;  %2625 = vrsqrt.f32 %v1036_v25 }
  0xaa   :  { %v942_v39 = vpop.xlane.xlu1 %941  ;;  %v939_v54 = vpop.xlane.xlu0 %938  ;;  %2627 = vrsqrt.f32 %v1035_v26 }
  0xab   :  { %v2618_v12 = vpop.eup %2617  ;;  %2273 = vmatprep.mubr.msk.f32.mxu1 %vm50_vm0, %v1045_v46  ;;  %v962_v8 = vadd.f32 1e-12, %v942_v39 }
  0xac   :  { %v2620_v13 = vpop.eup %2619  ;;  %v3383_v4 = vmul.f32 %v2618_v12, %v2891_v17 }
  0xad   :  { %v3386_v23 = vmul.f32 %v2620_v13, %v2894_v18  ;;  %v961_v18 = vadd.f32 1e-12, %v939_v54  ;;  %2629 = vrsqrt.f32 %v962_v8 }
  0xae   :  { %v948_v22 = vpop.xlane.xlu1 %947  ;;  %v945_v16 = vpop.xlane.xlu0 %944  ;;  %v2471_v17 = vpack.c.bf16 %v3383_v4, %v3380_v3 }
  0xaf   :  { %v2622_v60 = vpop.eup %2621  ;;  %v2465_v15 = vpack.c.bf16 %v3386_v23, %v1045_v46  ;;  %2631 = vrsqrt.f32 %v961_v18  ;;  %v964_v26 = vadd.f32 1e-12, %v948_v22  ;;  %v963_v59 = vadd.f32 1e-12, %v945_v16 }
  0xb0   :  { %v2624_v44 = vpop.eup %2623  ;;  %v3407_v46 = vmul.f32 %v2622_v60, %v2897_v19 }
  0xb1   :  { %2467 = vmatprep.subr.msk.bf16.mxu1 %vm3390_vm1, %v2465_v15  ;;  %v3404_v25 = vmul.f32 %v2624_v44, %v2900_v20  ;;  %2633 = vrsqrt.f32 %v964_v26 }
  0xb2   :  { %2470 = vmatpush3.bf16.xpose.msk.msra.mxu1 %vm3390_vm1, %v2465_v15  ;;  %v954_v24 = vpop.xlane.xlu1 %953  ;;  %v951_v55 = vpop.xlane.xlu0 %950  ;;  %2635 = vrsqrt.f32 %v963_v59 }
  0xb3   :  { %2473 = vmatprep.subr.msk.bf16.mxu1 %vm3390_vm1, %v2471_v17  ;;  %v2626_v54 = vpop.eup %2625  ;;  %v2477_v13 = vpack.c.bf16 %v3407_v46, %v3404_v25  ;;  %v966_v16 = vadd.f32 1e-12, %v954_v24 }
  0xb4   :  { %v2628_v15 = vpop.eup %2627  ;;  %v3419_v60 = vmul.f32 %v2626_v54, %v2924_v30 }
  0xb5   :  { %v3416_v22 = vmul.f32 %v2628_v15, %v2927_v31 }
  0xb6   :  { %v960_v39 = vpop.xlane.xlu1 %959  ;;  %v957_v12 = vpop.xlane.xlu0 %956 }
  0xb7   :  { %v2483_v26 = vpack.c.bf16 %v3419_v60, %v3416_v22  ;;  %v967_v58 = vadd.f32 1e-12, %v957_v12 }
  0xba   :  { %2476 = vmatpush3.bf16.xpose.msk.msra.mxu1 %vm3390_vm1, %v2471_v17  ;;  %v124_v20 = vpop.xlane.xlu1 %123  ;;  %v121_v44 = vpop.xlane.xlu0 %120 }
  0xbb   :  { %v144_v52 = vadd.f32 1e-12, %v124_v20  ;;  %v143_v19 = vadd.f32 1e-12, %v121_v44  ;;  %2479 = vmatprep.subr.msk.bf16.mxu1 %vm3390_vm1, %v2477_v13  ;;  %v2630_v17 = vpop.eup %2629  ;;  %v965_v44 = vadd.f32 1e-12, %v951_v55 }
  0xbc   :  { %v2632_v20 = vpop.eup %2631  ;;  %v3431_v59 = vmul.f32 %v2630_v17, %v2945_v41 }
  0xbd   :  { %2637 = vrsqrt.f32 %v144_v52  ;;  %v3428_v52 = vmul.f32 %v2632_v20, %v2948_v42  ;;  %v2634_v24 = vpop.eup %2633 }
  0xbe   :  { %2639 = vrsqrt.f32 %v143_v19  ;;  %v1336_v8 = vpop.xlane.xlu1 %1335  ;;  %v1333_v18 = vpop.xlane.xlu0 %1332  ;;  %v968_v19 = vadd.f32 1e-12, %v960_v39  ;;  %v3442_v20 = vmul.f32 %v2634_v24, %v2957_v47 }
  0xbf   :  { %2641 = vrsqrt.f32 %v966_v16  ;;  %v2636_v55 = vpop.eup %2635 }
  0xc0   :  { %2643 = vrsqrt.f32 %v965_v44 }
  0xc2   :  { %2482 = vmatpush3.bf16.xpose.msk.msra.mxu1 %vm3390_vm1, %v2477_v13  ;;  %v130_v31 = vpop.xlane.xlu1 %129  ;;  %v127_v15 = vpop.xlane.xlu0 %126 }
  0xc3   :  { %v146_v30 = vadd.f32 1e-12, %v130_v31  ;;  %v145_v54 = vadd.f32 1e-12, %v127_v15  ;;  %2485 = vmatprep.subr.msk.bf16.mxu1 %vm3390_vm1, %v2483_v26  ;;  %v2489_v31 = vpack.c.bf16 %v3431_v59, %v3428_v52 }
  0xc5   :  { %2645 = vrsqrt.f32 %v146_v30 }
  0xc6   :  { %2647 = vrsqrt.f32 %v145_v54  ;;  %v1342_v13 = vpop.xlane.xlu1 %1341  ;;  %v1339_v16 = vpop.xlane.xlu0 %1338 }
  0xc7   :  { %v2638_v53 = vpop.eup %2637  ;;  %2649 = vrsqrt.f32 %v968_v19  ;;  %v1355_v19 = vadd.f32 1e-12, %v1333_v18 }
  0xc8   :  { %v2640_v15 = vpop.eup %2639  ;;  %v3436_v42 = vmul.f32 %v2638_v53, %v3021_v28  ;;  %v3448_v28 = vmul.f32 %v2636_v55, %v2960_v48  ;;  %2651 = vrsqrt.f32 %v967_v58  ;;  %v1356_v53 = vadd.f32 1e-12, %v1336_v8 }
  0xc9   :  { %v159_v41 = vmul.f32 %v2640_v15, %v3025_v29  ;;  %v2642_v29 = vpop.eup %2641 }
  0xca   :  { %2488 = vmatpush3.bf16.xpose.msk.msra.mxu1 %vm3390_vm1, %v2483_v26  ;;  %v136_v17 = vpop.xlane.xlu1 %135  ;;  %v133_v39 = vpop.xlane.xlu0 %132  ;;  %v2495_v48 = vpack.c.bf16 %v3442_v20, %v3448_v28  ;;  %v3472_v18 = vmul.f32 %v2642_v29, %v2963_v49  ;;  %v1357_v29 = vadd.f32 1e-12, %v1339_v16  ;;  %v4043_v16 = vld [vmem:[#allocation5_spill] sm:$0xff] }
  0xcb   :  { %v148_v44 = vadd.f32 1e-12, %v136_v17  ;;  %v147_v30 = vadd.f32 1e-12, %v133_v39  ;;  %v2369_v54 = vpack.c.bf16 %v3436_v42, %v159_v41  ;;  %2491 = vmatprep.subr.msk.bf16.mxu1 %vm3390_vm1, %v2489_v31  ;;  %2161 = vmatprep.mubr.msk.f32.mxu0 %vm50_vm0, %v159_v41  ;;  %v2644_v47 = vpop.eup %2643 }
  0xcd   :  { %2653 = vrsqrt.f32 %v148_v44  ;;  %2371 = vmatprep.subr.msk.bf16.mxu0 %vm3390_vm1, %v2369_v54  ;;  %v1358_v44 = vadd.f32 1e-12, %v1342_v13 }
  0xce   :  { %2655 = vrsqrt.f32 %v147_v30  ;;  %2374 = vmatpush3.bf16.xpose.msk.msra.mxu0 %vm3390_vm1, %v2369_v54  ;;  %v1348_v12 = vpop.xlane.xlu1 %1347  ;;  %v3455_v26 = vpop.xlane.xlu0 %1344 }
  0xcf   :  { %v2646_v24 = vpop.eup %2645  ;;  %2657 = vrsqrt.f32 %v1356_v53 }
  0xd0   :  { %v2648_v55 = vpop.eup %2647  ;;  %v3460_v58 = vmul.f32 %v2646_v24, %v3069_v43  ;;  %2659 = vrsqrt.f32 %v1355_v19  ;;  %v4042_v24 = vld [vmem:[#allocation6_spill] sm:$0xff] }
  0xd1   :  { %2274 = vmatmul.mubr.msk.f32.vlgmr.msra.gmra.mrb[0].mxu1 %vm50_vm0, %v3386_v23  ;;  %v3465_v8 = vmul.f32 %v2648_v55, %v3076_v45  ;;  %v3479_v45 = vmul.f32 %v2644_v47, %v2966_v50 }
  0xd2   :  { %2276 = vmatprep.mubr.msk.f32.mxu1 %vm50_vm0, %v3380_v3  ;;  %2494 = vmatpush3.bf16.xpose.msk.msra.mxu1 %vm3390_vm1, %v2489_v31  ;;  %v142_v15 = vpop.xlane.xlu1 %141  ;;  %v139_v41 = vpop.xlane.xlu0 %138 }
  0xd3   :  { %v150_v43 = vadd.f32 1e-12, %v142_v15  ;;  %v149_v17 = vadd.f32 1e-12, %v139_v41  ;;  %v2375_v23 = vpack.c.bf16 %v3460_v58, %v3465_v8  ;;  %2497 = vmatprep.subr.msk.bf16.mxu1 %vm3390_vm1, %v2495_v48  ;;  %v2650_v3 = vpop.eup %2649  ;;  %v2501_v30 = vpack.c.bf16 %v3472_v18, %v3479_v45 }
  0xd4   :  { %v2652_v49 = vpop.eup %2651 }
  0xd5   :  { %2661 = vrsqrt.f32 %v150_v43  ;;  %2377 = vmatprep.subr.msk.bf16.mxu0 %vm3390_vm1, %v2375_v23  ;;  %2277 = vmatmul.mubr.msk.f32.gmra.mrb[2].mxu1 %vm50_vm0, %v3383_v4  ;;  %v4041_v4 = vld [vmem:[#allocation15_spill] sm:$0xff]  ;;  %v3504_v55 = vmul.f32 %v2652_v49, %v4042_v24 }
  0xd6   :  { %2663 = vrsqrt.f32 %v149_v17  ;;  %2380 = vmatpush3.bf16.xpose.msk.msra.mxu0 %vm3390_vm1, %v2375_v23  ;;  %2279 = vmatprep.mubr.msk.f32.mxu1 %vm50_vm0, %v3404_v25  ;;  %v1354_v31 = vpop.xlane.xlu1 %1353  ;;  %v1351_v50 = vpop.xlane.xlu0 %1350  ;;  %v1360_v23 = vadd.f32 1e-12, %v1348_v12  ;;  %v4045_v12 = vld [vmem:[#allocation8_spill] sm:$0xff] }
  0xd7   :  { %v2654_v39 = vpop.eup %2653  ;;  %2665 = vrsqrt.f32 %v1358_v44 }
  0xd8   :  { %v2656_v54 = vpop.eup %2655  ;;  %v3492_v47 = vmul.f32 %v2654_v39, %v3132_v7  ;;  %v3507_v7 = vmul.f32 %v2650_v3, %v4043_v16  ;;  %2667 = vrsqrt.f32 %v1357_v29  ;;  %v1359_v39 = vadd.f32 1e-12, %v3455_v26  ;;  %v4044_v29 = vld [vmem:[#allocation9_spill] sm:$0xff] }
  0xd9   :  { %2280 = vmatmul.mubr.msk.f32.gmra.mrb[4].mxu1 %vm50_vm0, %v3407_v46  ;;  %v3497_v53 = vmul.f32 %v2656_v54, %v4041_v4 }
  0xda   :  { %2282 = vmatprep.mubr.msk.f32.mxu1 %vm50_vm0, %v3416_v22  ;;  %2500 = vmatpush3.bf16.xpose.msk.msra.mxu1 %vm3390_vm1, %v2495_v48  ;;  %v56_v25 = vpop.xlane.xlu1 %55  ;;  %v53_v13 = vpop.xlane.xlu0 %52  ;;  %v2507_v3 = vpack.c.bf16 %v3507_v7, %v3504_v55 }
  0xdb   :  { %v76_v19 = vadd.f32 1e-12, %v56_v25  ;;  %v75_v46 = vadd.f32 1e-12, %v53_v13  ;;  %v2381_v15 = vpack.c.bf16 %v3492_v47, %v3497_v53  ;;  %2503 = vmatprep.subr.msk.bf16.mxu1 %vm3390_vm1, %v2501_v30  ;;  %v2658_v22 = vpop.eup %2657 }
  0xdc   :  { %v2660_v48 = vpop.eup %2659  ;;  %v3536_v25 = vmul.f32 %v2658_v22, %v4045_v12 }
  0xdd   :  { %2669 = vrsqrt.f32 %v76_v19  ;;  %2383 = vmatprep.subr.msk.bf16.mxu0 %vm3390_vm1, %v2381_v15  ;;  %2283 = vmatmul.mubr.msk.f32.gmra.mrb[6].mxu1 %vm50_vm0, %v3419_v60  ;;  %v3533_v4 = vmul.f32 %v2660_v48, %v4044_v29  ;;  %v1361_v48 = vadd.f32 1e-12, %v1351_v50 }
  0xde   :  { %2671 = vrsqrt.f32 %v75_v46  ;;  %2386 = vmatpush3.bf16.xpose.msk.msra.mxu0 %vm3390_vm1, %v2381_v15  ;;  %2301 = vmatprep.mubr.msk.f32.mxu1 %vm50_vm0, %v3428_v52  ;;  %v1541_v41 = vpop.xlane.xlu1 %1540  ;;  %v1538_v43 = vpop.xlane.xlu0 %1537  ;;  %v1362_v46 = vadd.f32 1e-12, %v1354_v31  ;;  %v4047_v31 = vld [vmem:[#allocation13_spill] sm:$0xff] }
  0xdf   :  { %v2662_v17 = vpop.eup %2661  ;;  %2673 = vrsqrt.f32 %v1360_v23  ;;  %v2513_v15 = vpack.c.bf16 %v3536_v25, %v3533_v4 }
  0xe0   :  { %v2664_v49 = vpop.eup %2663  ;;  %v3525_v60 = vmul.f32 %v2662_v17, %v3196_v2  ;;  %2675 = vrsqrt.f32 %v1359_v39 }
  0xe1   :  { %v3528_v44 = vmul.f32 %v2664_v49, %v3200_v38  ;;  %v2666_v38 = vpop.eup %2665 }
  0xe2   :  { %2506 = vmatpush3.bf16.xpose.msk.msra.mxu1 %vm3390_vm1, %v2501_v30  ;;  %v62_v52 = vpop.xlane.xlu1 %61  ;;  %v59_v54 = vpop.xlane.xlu0 %58  ;;  %v3562_v29 = vmul.f32 %v2666_v38, %v4047_v31  ;;  %v1561_v38 = vadd.f32 1e-12, %v1541_v41 }
  0xe3   :  { %v78_v13 = vadd.f32 1e-12, %v62_v52  ;;  %v77_v26 = vadd.f32 1e-12, %v59_v54  ;;  %v2387_v2 = vpack.c.bf16 %v3525_v60, %v3528_v44  ;;  %2509 = vmatprep.subr.msk.bf16.mxu1 %vm3390_vm1, %v2507_v3  ;;  %v2668_v30 = vpop.eup %2667  ;;  %v4046_v52 = vld [vmem:[#allocation14_spill] sm:$0xff] }
  0xe4   :  { %v3559_v54 = vmul.f32 %v2668_v30, %v4046_v52 }
  0xe5   :  { %2677 = vrsqrt.f32 %v78_v13  ;;  %2389 = vmatprep.subr.msk.bf16.mxu0 %vm3390_vm1, %v2387_v2 }
  0xe6   :  { %2679 = vrsqrt.f32 %v77_v26  ;;  %2392 = vmatpush3.bf16.xpose.msk.msra.mxu0 %vm3390_vm1, %v2387_v2  ;;  %v1547_v24 = vpop.xlane.xlu1 %1546  ;;  %v3546_v16 = vpop.xlane.xlu0 %1543 }
  0xe7   :  { %v2670_v19 = vpop.eup %2669  ;;  %2681 = vrsqrt.f32 %v1362_v46  ;;  %v1563_v31 = vadd.f32 1e-12, %v1547_v24 }
  0xe8   :  { %v2672_v22 = vpop.eup %2671  ;;  %v3551_v17 = vmul.f32 %v2670_v19, %v3232_v11  ;;  %2683 = vrsqrt.f32 %v1361_v48  ;;  %v1560_v19 = vadd.f32 1e-12, %v1538_v43  ;;  %v4048_v43 = vld [vmem:[#allocation24_spill] sm:$0xff]  ;;  %v4049_v48 = vld [vmem:[#allocation22_spill] sm:$0xff] }
  0xe9   :  { %v3554_v23 = vmul.f32 %v2672_v22, %v3235_v14  ;;  %v2674_v14 = vpop.eup %2673 }
  0xea   :  { %2512 = vmatpush3.bf16.xpose.msk.msra.mxu1 %vm3390_vm1, %v2507_v3  ;;  %v68_v49 = vpop.xlane.xlu1 %67  ;;  %v65_v39 = vpop.xlane.xlu0 %64 }
  0xeb   :  { %v80_v12 = vadd.f32 1e-12, %v68_v49  ;;  %v79_v50 = vadd.f32 1e-12, %v65_v39  ;;  %v2393_v11 = vpack.c.bf16 %v3551_v17, %v3554_v23  ;;  %2515 = vmatprep.subr.msk.bf16.mxu1 %vm3390_vm1, %v2513_v15  ;;  %v2676_v3 = vpop.eup %2675  ;;  %v3600_v49 = vmul.f32 %v2674_v14, %v4049_v48 }
  0xed   :  { %2685 = vrsqrt.f32 %v80_v12  ;;  %2162 = vmatmul.mubr.msk.f32.vlgmr.msra.gmra.mrb[0].mxu0 %vm50_vm0, %v3436_v42  ;;  %2395 = vmatprep.subr.msk.bf16.mxu0 %vm3390_vm1, %v2393_v11  ;;  %v2519_v42 = vpack.c.bf16 %v3562_v29, %v3559_v54 }
  0xee   :  { %2687 = vrsqrt.f32 %v79_v50  ;;  %2398 = vmatpush3.bf16.xpose.msk.msra.mxu0 %vm3390_vm1, %v2393_v11  ;;  %v3574_v13 = vpop.xlane.xlu1 %1552  ;;  %v3576_v26 = vpop.xlane.xlu0 %1549  ;;  %2164 = vmatprep.mubr.msk.f32.mxu0 %vm50_vm0, %v3465_v8  ;;  %v1562_v50 = vadd.f32 1e-12, %v3546_v16 }
  0xef   :  { %v2678_v2 = vpop.eup %2677  ;;  %2689 = vrsqrt.f32 %v1561_v38 }
  0xf0   :  { %v2680_v30 = vpop.eup %2679  ;;  %v3583_v46 = vmul.f32 %v2678_v2, %v3244_v63  ;;  %v3597_v63 = vmul.f32 %v2676_v3, %v4048_v43  ;;  %2691 = vrsqrt.f32 %v1560_v19 }
  0xf1   :  { %2302 = vmatmul.mubr.msk.f32.vlgmr.msra.gmra.mrb[0].mxu1 %vm50_vm0, %v3431_v59  ;;  %2165 = vmatmul.mubr.msk.f32.gmra.mrb[2].mxu0 %vm50_vm0, %v3460_v58  ;;  %v3590_v22 = vmul.f32 %v2680_v30, %v3247_v0 }
  0xf2   :  { %2304 = vmatprep.mubr.msk.f32.mxu1 %vm50_vm0, %v3448_v28  ;;  %2518 = vmatpush3.bf16.xpose.msk.msra.mxu1 %vm3390_vm1, %v2513_v15  ;;  %v74_v8 = vpop.xlane.xlu1 %73  ;;  %v71_v41 = vpop.xlane.xlu0 %70 }
  0xf3   :  { %v82_v59 = vadd.f32 1e-12, %v74_v8  ;;  %v81_v58 = vadd.f32 1e-12, %v71_v41  ;;  %v2399_v0 = vpack.c.bf16 %v3583_v46, %v3590_v22  ;;  %2521 = vmatprep.subr.msk.bf16.mxu1 %vm3390_vm1, %v2519_v42  ;;  %2167 = vmatprep.mubr.msk.f32.mxu0 %vm50_vm0, %v3497_v53  ;;  %v2682_v28 = vpop.eup %2681  ;;  %v4050_v41 = vld [vmem:[#allocation7_spill] sm:$0xff] }
  0xf4   :  { %v2684_v15 = vpop.eup %2683  ;;  %v3643_v16 = vmul.f32 %v2682_v28, %v3212_v34 }
  0xf5   :  { %2693 = vrsqrt.f32 %v82_v59  ;;  %2401 = vmatprep.subr.msk.bf16.mxu0 %vm3390_vm1, %v2399_v0  ;;  %2305 = vmatmul.mubr.msk.f32.gmra.mrb[2].mxu1 %vm50_vm0, %v3442_v20  ;;  %v2525_v20 = vpack.c.bf16 %v3600_v49, %v3597_v63 }
  0xf6   :  { %2695 = vrsqrt.f32 %v81_v58  ;;  %2404 = vmatpush3.bf16.xpose.msk.msra.mxu0 %vm3390_vm1, %v2399_v0  ;;  %2307 = vmatprep.mubr.msk.f32.mxu1 %vm50_vm0, %v3479_v45  ;;  %v3616_v39 = vpop.xlane.xlu1 %1558  ;;  %v3618_v53 = vpop.xlane.xlu0 %1555 }
  0xf7   :  { %v2686_v52 = vpop.eup %2685  ;;  %2168 = vmatmul.mubr.msk.f32.gmra.mrb[4].mxu0 %vm50_vm0, %v3492_v47  ;;  %2697 = vrsqrt.f32 %v1563_v31 }
  0xf8   :  { %v2688_v12 = vpop.eup %2687  ;;  %v3626_v11 = vmul.f32 %v2686_v52, %v3268_v57  ;;  %2170 = vmatprep.mubr.msk.f32.mxu0 %vm50_vm0, %v3528_v44  ;;  %v3640_v57 = vmul.f32 %v2684_v15, %v3223_v56  ;;  %2699 = vrsqrt.f32 %v1562_v50 }
  0xf9   :  { %2308 = vmatmul.mubr.msk.f32.gmra.mrb[4].mxu1 %vm50_vm0, %v3472_v18  ;;  %v3633_v45 = vmul.f32 %v2688_v12, %v3271_v9  ;;  %v2690_v56 = vpop.eup %2689  ;;  %v1567_v12 = vadd.f32 1e-12, %v3616_v39 }
  0xfa   :  { %2310 = vmatprep.mubr.msk.f32.mxu1 %vm50_vm0, %v3504_v55  ;;  %2524 = vmatpush3.bf16.xpose.msk.msra.mxu1 %vm3390_vm1, %v2519_v42  ;;  %v450_v47 = vpop.xlane.xlu1 %449  ;;  %v447_v24 = vpop.xlane.xlu0 %446  ;;  %v2531_v38 = vpack.c.bf16 %v3643_v16, %v3640_v57  ;;  %v3677_v43 = vmul.f32 %v2690_v56, %v4050_v41 }
  0xfb   :  { %v470_v44 = vadd.f32 1e-12, %v450_v47  ;;  %v469_v18 = vadd.f32 1e-12, %v447_v24  ;;  %v2405_v9 = vpack.c.bf16 %v3626_v11, %v3633_v45  ;;  %2527 = vmatprep.subr.msk.bf16.mxu1 %vm3390_vm1, %v2525_v20  ;;  %2171 = vmatmul.mubr.msk.f32.gmra.mrb[6].mxu0 %vm50_vm0, %v3525_v60  ;;  %v2692_v34 = vpop.eup %2691  ;;  %v1566_v47 = vadd.f32 1e-12, %v3618_v53 }
  0xfc   :  { %2189 = vmatprep.mubr.msk.f32.mxu0 %vm50_vm0, %v3554_v23  ;;  %v1565_v23 = vadd.f32 1e-12, %v3574_v13  ;;  %v3674_v8 = vmul.f32 %v2692_v34, %v3010_v10 }
  0xfd   :  { %2701 = vrsqrt.f32 %v470_v44  ;;  %2407 = vmatprep.subr.msk.bf16.mxu0 %vm3390_vm1, %v2405_v9  ;;  %2311 = vmatmul.mubr.msk.f32.gmra.mrb[6].mxu1 %vm50_vm0, %v3507_v7  ;;  %v1564_v7 = vadd.f32 1e-12, %v3576_v26 }
  0xfe   :  { %2703 = vrsqrt.f32 %v469_v18  ;;  %2410 = vmatpush3.bf16.xpose.msk.msra.mxu0 %vm3390_vm1, %v2405_v9  ;;  %2329 = vmatprep.mubr.msk.f32.mxu1 %vm50_vm0, %v3533_v4  ;;  %v456_v55 = vpop.xlane.xlu1 %455  ;;  %v453_v60 = vpop.xlane.xlu0 %452  ;;  %v2537_v28 = vpack.c.bf16 %v3677_v43, %v3674_v8 }
  0xff   :  { %v2694_v14 = vpop.eup %2693  ;;  %v472_v3 = vadd.f32 1e-12, %v456_v55  ;;  %v471_v2 = vadd.f32 1e-12, %v453_v60 }
 0x100   :  { %v2696_v42 = vpop.eup %2695  ;;  %v3666_v30 = vmul.f32 %v2694_v14, %v3280_v51 }
 0x101   :  { %2705 = vrsqrt.f32 %v472_v3  ;;  %v3669_v19 = vmul.f32 %v2696_v42, %v3283_v27  ;;  %v2698_v48 = vpop.eup %2697 }
 0x102   :  { %2530 = vmatpush3.bf16.xpose.msk.msra.mxu1 %vm3390_vm1, %v2525_v20  ;;  %2707 = vrsqrt.f32 %v471_v2  ;;  %v462_v4 = vpop.xlane.xlu1 %461  ;;  %v459_v13 = vpop.xlane.xlu0 %458 }
 0x103   :  { %2709 = vrsqrt.f32 %v1565_v23  ;;  %v2411_v51 = vpack.c.bf16 %v3666_v30, %v3669_v19  ;;  %2533 = vmatprep.subr.msk.bf16.mxu1 %vm3390_vm1, %v2531_v38  ;;  %v474_v27 = vadd.f32 1e-12, %v462_v4  ;;  %v473_v26 = vadd.f32 1e-12, %v459_v13  ;;  %v2700_v10 = vpop.eup %2699  ;;  %v4053_v4 = vld [vmem:[#allocation11_spill] sm:$0xff] }
 0x104   :  { %2711 = vrsqrt.f32 %v1564_v7 }
 0x105   :  { %2413 = vmatprep.subr.msk.bf16.mxu0 %vm3390_vm1, %v2411_v51  ;;  %2713 = vrsqrt.f32 %v474_v27 }
 0x106   :  { %2416 = vmatpush3.bf16.xpose.msk.msra.mxu0 %vm3390_vm1, %v2411_v51  ;;  %2715 = vrsqrt.f32 %v473_v26  ;;  %v468_v59 = vpop.xlane.xlu1 %467  ;;  %v465_v58 = vpop.xlane.xlu0 %464  ;;  %v4054_v26 = vld [vmem:[#allocation17_spill] sm:$0xff] }
 0x107   :  { %v2702_v0 = vpop.eup %2701  ;;  %v476_v15 = vadd.f32 1e-12, %v468_v59  ;;  %v475_v52 = vadd.f32 1e-12, %v465_v58 }
 0x108   :  { %v2704_v31 = vpop.eup %2703  ;;  %v3690_v20 = vmul.f32 %v2702_v0, %v3100_v61  ;;  %v3704_v61 = vmul.f32 %v2700_v10, %v3048_v37  ;;  %v4055_v10 = vld [vmem:[#allocation16_spill] sm:$0xff] }
 0x109   :  { %v3694_v50 = vmul.f32 %v2704_v31, %v3104_v62  ;;  %2717 = vrsqrt.f32 %v476_v15  ;;  %v3707_v62 = vmul.f32 %v2698_v48, %v3029_v32  ;;  %v4056_v31 = vld [vmem:[#allocation19_spill] sm:$0xff] }
 0x10a   :  { %2536 = vmatpush3.bf16.xpose.msk.msra.mxu1 %vm3390_vm1, %v2531_v38  ;;  %2719 = vrsqrt.f32 %v475_v52  ;;  %v655_v24 = vpop.xlane.xlu1 %654  ;;  %v652_v39 = vpop.xlane.xlu0 %651 }
 0x10b   :  { %v2706_v44 = vpop.eup %2705  ;;  %v2417_v18 = vpack.c.bf16 %v3690_v20, %v3694_v50  ;;  %2539 = vmatprep.subr.msk.bf16.mxu1 %vm3390_vm1, %v2537_v28  ;;  %2721 = vrsqrt.f32 %v1567_v12  ;;  %v675_v37 = vadd.f32 1e-12, %v655_v24  ;;  %v674_v32 = vadd.f32 1e-12, %v652_v39  ;;  %v4058_v39 = vld [vmem:[#allocation21_spill] sm:$0xff] }
 0x10c   :  { %v2708_v53 = vpop.eup %2707  ;;  %v3710_v9 = vmul.f32 %v2706_v44, %v3305_v33  ;;  %2723 = vrsqrt.f32 %v1566_v47  ;;  %v2543_v60 = vpack.c.bf16 %v3707_v62, %v3704_v61 }
 0x10d   :  { %v2710_v56 = vpop.eup %2709  ;;  %2190 = vmatmul.mubr.msk.f32.vlgmr.msra.gmra.mrb[0].mxu0 %vm50_vm0, %v3551_v17  ;;  %2419 = vmatprep.subr.msk.bf16.mxu0 %vm3390_vm1, %v2417_v18  ;;  %v3717_v34 = vmul.f32 %v2708_v53, %v3309_v21  ;;  %2725 = vrsqrt.f32 %v675_v37 }
 0x10e   :  { %v2712_v55 = vpop.eup %2711  ;;  %2422 = vmatpush3.bf16.xpose.msk.msra.mxu0 %vm3390_vm1, %v2417_v18  ;;  %2192 = vmatprep.mubr.msk.f32.mxu0 %vm50_vm0, %v3590_v22  ;;  %2727 = vrsqrt.f32 %v674_v32  ;;  %v661_v23 = vpop.xlane.xlu1 %660 }
 0x10f   :  { %v2714_v33 = vpop.eup %2713  ;;  %v2423_v17 = vpack.c.bf16 %v3710_v9, %v3717_v34  ;;  %v658_v3 = vpop.xlane.xlu0 %657  ;;  %v677_v38 = vadd.f32 1e-12, %v661_v23 }
 0x110   :  { %v2716_v14 = vpop.eup %2715  ;;  %v3728_v21 = vmul.f32 %v2714_v33, %v3319_v36 }
 0x111   :  { %2330 = vmatmul.mubr.msk.f32.vlgmr.msra.gmra.mrb[0].mxu1 %vm50_vm0, %v3536_v25  ;;  %2193 = vmatmul.mubr.msk.f32.gmra.mrb[2].mxu0 %vm50_vm0, %v3583_v46  ;;  %v3735_v22 = vmul.f32 %v2716_v14, %v3323_v5  ;;  %v3748_v5 = vmul.f32 %v2712_v55, %v3065_v40  ;;  %v4051_v46 = vld [vmem:[#allocation10_spill] sm:$0xff]  ;;  %v676_v40 = vadd.f32 1e-12, %v658_v3  ;;  %2729 = vrsqrt.f32 %v677_v38 }
 0x112   :  { %2332 = vmatprep.mubr.msk.f32.mxu1 %vm50_vm0, %v3559_v54  ;;  %2542 = vmatpush3.bf16.xpose.msk.msra.mxu1 %vm3390_vm1, %v2537_v28  ;;  %v3751_v54 = vmul.f32 %v2710_v56, %v4051_v46  ;;  %v4059_v56 = vld [vmem:[#allocation20_spill] sm:$0xff] }
 0x113   :  { %v2718_v36 = vpop.eup %2717  ;;  %2425 = vmatprep.subr.msk.bf16.mxu0 %vm3390_vm1, %v2423_v17  ;;  %2545 = vmatprep.subr.msk.bf16.mxu1 %vm3390_vm1, %v2543_v60  ;;  %v2429_v25 = vpack.c.bf16 %v3728_v21, %v3735_v22  ;;  %2731 = vrsqrt.f32 %v676_v40 }
 0x114   :  { %v2720_v2 = vpop.eup %2719  ;;  %2195 = vmatprep.mubr.msk.f32.mxu0 %vm50_vm0, %v3633_v45  ;;  %v2549_v45 = vpack.c.bf16 %v3751_v54, %v3748_v5 }
 0x115   :  { %2333 = vmatmul.mubr.msk.f32.gmra.mrb[2].mxu1 %vm50_vm0, %v3562_v29  ;;  %2196 = vmatmul.mubr.msk.f32.gmra.mrb[4].mxu0 %vm50_vm0, %v3626_v11  ;;  %v2722_v42 = vpop.eup %2721  ;;  %v3770_v29 = vmul.f32 %v2720_v2, %v3343_v1  ;;  %v3773_v11 = vmul.f32 %v2718_v36, %v3339_v35  ;;  %v667_v1 = vpop.xlane.xlu1 %666 }
 0x116   :  { %2428 = vmatpush3.bf16.xpose.msk.msra.mxu0 %vm3390_vm1, %v2423_v17  ;;  %2335 = vmatprep.mubr.msk.f32.mxu1 %vm50_vm0, %v3597_v63  ;;  %v2724_v7 = vpop.eup %2723  ;;  %v1583_v13 = vmul.f32 %v2722_v42, %v4053_v4  ;;  %v679_v41 = vadd.f32 1e-12, %v667_v1 }
 0x117   :  { %2431 = vmatprep.subr.msk.bf16.mxu0 %vm3390_vm1, %v2429_v25  ;;  %2198 = vmatprep.mubr.msk.f32.mxu0 %vm50_vm0, %v3669_v19  ;;  %v2726_v63 = vpop.eup %2725  ;;  %v2435_v35 = vpack.c.bf16 %v3773_v11, %v3770_v29 }
 0x118   :  { %v691_v59 = vmul.f32 %v2726_v63, %v4055_v10  ;;  %2733 = vrsqrt.f32 %v679_v41 }
 0x119   :  { %2336 = vmatmul.mubr.msk.f32.gmra.mrb[4].mxu1 %vm50_vm0, %v3600_v49  ;;  %2199 = vmatmul.mubr.msk.f32.gmra.mrb[6].mxu0 %vm50_vm0, %v3666_v30  ;;  %v4052_v49 = vld [vmem:[#allocation12_spill] sm:$0xff]  ;;  %v664_v30 = vpop.xlane.xlu0 %663 }
 0x11a   :  { %2338 = vmatprep.mubr.msk.f32.mxu1 %vm50_vm0, %v3640_v57  ;;  %2548 = vmatpush3.bf16.xpose.msk.msra.mxu1 %vm3390_vm1, %v2543_v60  ;;  %v1582_v19 = vmul.f32 %v2724_v7, %v4052_v49  ;;  %v2728_v57 = vpop.eup %2727  ;;  %v678_v51 = vadd.f32 1e-12, %v664_v30 }
 0x11b   :  { %2551 = vmatprep.subr.msk.bf16.mxu1 %vm3390_vm1, %v2549_v45  ;;  %2217 = vmatprep.mubr.msk.f32.mxu0 %vm50_vm0, %v3694_v50  ;;  %v690_v48 = vmul.f32 %v2728_v57, %v4054_v26  ;;  %v2730_v58 = vpop.eup %2729  ;;  %v4057_v50 = vld [vmem:[#allocation18_spill] sm:$0xff] }
 0x11c   :  { %v2555_v27 = vpack.c.bf16 %v1583_v13, %v1582_v19  ;;  %2735 = vrsqrt.f32 %v678_v51  ;;  %v693_v47 = vmul.f32 %v2730_v58, %v4057_v50 }
 0x11d   :  { %2339 = vmatmul.mubr.msk.f32.gmra.mrb[6].mxu1 %vm50_vm0, %v3643_v16  ;;  %v673_v16 = vpop.xlane.xlu1 %672  ;;  %v670_v0 = vpop.xlane.xlu0 %669 }
 0x11e   :  { %2434 = vmatpush3.bf16.xpose.msk.msra.mxu0 %vm3390_vm1, %v2429_v25  ;;  %2357 = vmatprep.mubr.msk.f32.mxu1 %vm50_vm0, %v3674_v8  ;;  %v2441_v8 = vpack.c.bf16 %v691_v59, %v690_v48  ;;  %v2732_v28 = vpop.eup %2731  ;;  %v681_v15 = vadd.f32 1e-12, %v673_v16  ;;  %v680_v52 = vadd.f32 1e-12, %v670_v0 }
 0x11f   :  { %2437 = vmatprep.subr.msk.bf16.mxu0 %vm3390_vm1, %v2435_v35  ;;  %v692_v12 = vmul.f32 %v2732_v28, %v4056_v31 }
 0x120   :  { %2737 = vrsqrt.f32 %v681_v15 }
 0x121   :  { %2739 = vrsqrt.f32 %v680_v52  ;;  %v2447_v44 = vpack.c.bf16 %v693_v47, %v692_v12 }
 0x122   :  { %2554 = vmatpush3.bf16.xpose.msk.msra.mxu1 %vm3390_vm1, %v2549_v45  ;;  %v2734_v24 = vpop.eup %2733 }
 0x123   :  { %2557 = vmatprep.subr.msk.bf16.mxu1 %vm3390_vm1, %v2555_v27  ;;  %v695_v37 = vmul.f32 %v2734_v24, %v4059_v56 }
 0x126   :  { %2440 = vmatpush3.bf16.xpose.msk.msra.mxu0 %vm3390_vm1, %v2435_v35  ;;  %v2736_v18 = vpop.eup %2735 }
 0x127   :  { %2443 = vmatprep.subr.msk.bf16.mxu0 %vm3390_vm1, %v2441_v8  ;;  %v694_v53 = vmul.f32 %v2736_v18, %v4058_v39 }
 0x12a   :  { %2560 = vmatpush3.bf16.xpose.msk.msra.mxu1 %vm3390_vm1, %v2555_v27 }
 0x12d   :  { %2218 = vmatmul.mubr.msk.f32.vlgmr.msra.gmra.mrb[0].mxu0 %vm50_vm0, %v3690_v20  ;;  %v2738_v20 = vpop.eup %2737 }
 0x12e   :  { %2446 = vmatpush3.bf16.xpose.msk.msra.mxu0 %vm3390_vm1, %v2441_v8  ;;  %2220 = vmatprep.mubr.msk.f32.mxu0 %vm50_vm0, %v3717_v34  ;;  %v2453_v34 = vpack.c.bf16 %v695_v37, %v694_v53  ;;  %v2740_v55 = vpop.eup %2739 }
 0x12f   :  { %2449 = vmatprep.subr.msk.bf16.mxu0 %vm3390_vm1, %v2447_v44 }
 0x131   :  { %2358 = vmatmul.mubr.msk.f32.vlgmr.msra.gmra.mrb[0].mxu1 %vm50_vm0, %v3677_v43  ;;  %2221 = vmatmul.mubr.msk.f32.gmra.mrb[2].mxu0 %vm50_vm0, %v3710_v9  ;;  %v4060_v43 = vld [vmem:[#allocation25_spill] sm:$0xff]  ;;  %v4061_v9 = vld [vmem:[#allocation23_spill] sm:$0xff] }
 0x132   :  { %2360 = vmatprep.mubr.msk.f32.mxu1 %vm50_vm0, %v3704_v61  ;;  %2223 = vmatprep.mubr.msk.f32.mxu0 %vm50_vm0, %v3735_v22  ;;  %v696_v61 = vmul.f32 %v2740_v55, %v4060_v43  ;;  %v697_v32 = vmul.f32 %v2738_v20, %v4061_v9 }
 0x135   :  { %2361 = vmatmul.mubr.msk.f32.gmra.mrb[2].mxu1 %vm50_vm0, %v3707_v62  ;;  %2224 = vmatmul.mubr.msk.f32.gmra.mrb[4].mxu0 %vm50_vm0, %v3728_v21  ;;  %v2459_v62 = vpack.c.bf16 %v697_v32, %v696_v61 }
 0x136   :  { %2452 = vmatpush3.bf16.xpose.msk.msra.mxu0 %vm3390_vm1, %v2447_v44  ;;  %2363 = vmatprep.mubr.msk.f32.mxu1 %vm50_vm0, %v3748_v5 }
 0x137   :  { %2455 = vmatprep.subr.msk.bf16.mxu0 %vm3390_vm1, %v2453_v34  ;;  %2226 = vmatprep.mubr.msk.f32.mxu0 %vm50_vm0, %v3770_v29 }
 0x139   :  { %2364 = vmatmul.mubr.msk.f32.gmra.mrb[4].mxu1 %vm50_vm0, %v3751_v54  ;;  %2227 = vmatmul.mubr.msk.f32.gmra.mrb[6].mxu0 %vm50_vm0, %v3773_v11 }
 0x13a   :  { %2366 = vmatprep.mubr.msk.f32.mxu1 %vm50_vm0, %v1582_v19  ;;  %2245 = vmatprep.mubr.msk.f32.mxu0 %vm50_vm0, %v690_v48 }
 0x13d   :  { %2367 = vmatmul.mubr.msk.f32.gmra.mrb[6].mxu1 %vm50_vm0, %v1583_v13 }
 0x13e   :  { %2458 = vmatpush3.bf16.xpose.msk.msra.mxu0 %vm3390_vm1, %v2453_v34 }
 0x13f   :  { %2461 = vmatprep.subr.msk.bf16.mxu0 %vm3390_vm1, %v2459_v62 }
 0x146   :  { %2464 = vmatpush3.bf16.xpose.msk.msra.mxu0 %vm3390_vm1, %v2459_v62 }
 0x14d   :  { %2246 = vmatmul.mubr.msk.f32.vlgmr.msra.gmra.mrb[0].mxu0 %vm50_vm0, %v691_v59 }
 0x14e   :  { %2248 = vmatprep.mubr.msk.f32.mxu0 %vm50_vm0, %v692_v12 }
 0x151   :  { %2249 = vmatmul.mubr.msk.f32.gmra.mrb[2].mxu0 %vm50_vm0, %v693_v47 }
 0x152   :  { %2251 = vmatprep.mubr.msk.f32.mxu0 %vm50_vm0, %v694_v53 }
 0x155   :  { %2252 = vmatmul.mubr.msk.f32.gmra.mrb[4].mxu0 %vm50_vm0, %v695_v37 }
 0x156   :  { %2254 = vmatprep.mubr.msk.f32.mxu0 %vm50_vm0, %v696_v61 }
 0x159   :  { %2255 = vmatmul.mubr.msk.f32.gmra.mrb[6].mxu0 %vm50_vm0, %v697_v32 }
 0x204   :  { %v2359_v33 = vpop.f32.mrb[0].mxu1 }
 0x205   :  { %v1722_v17 = vmul.f32 0.25, %v2359_v33  ;;  %v1674_v60 = vpop.f32.mrb[1].mxu1 }
 0x206   :  { %v1721_v14 = vmul.f32 0.25, %v1674_v60 }
 0x207   :  { %vm1730_vm3 = vcmp.gt.f32.partialorder %v1722_v17, 0.1 }
 0x208   :  { %v2362_v6 = vpop.f32.mrb[2].mxu1  ;;  %v3865_v21 = vsel %vm1730_vm3, %v1722_v17, 0.0  ;;  %vm1729_vm4 = vcmp.gt.f32.partialorder %v1721_v14, 0.1 }
 0x209   :  { %v1724_v22 = vmul.f32 0.25, %v2362_v6  ;;  %v1684_v23 = vpop.f32.mrb[3].mxu1  ;;  %v1748_v36 = vsel %vm859_vm2, %v3865_v21, 0.0  ;;  %v3869_v25 = vsel %vm1729_vm4, %v1721_v14, 0.0 }
 0x20a   :  { %v1723_v5 = vmul.f32 0.25, %v1684_v23  ;;  %1749 = vadd.xlane.f32.xlu1 %v1748_v36  ;;  %v1745_v46 = vsel %vm859_vm2, %v3869_v25, 0.0 }
 0x20b   :  { %1746 = vadd.xlane.f32.xlu0 %v1745_v46  ;;  %vm1732_vm5 = vcmp.gt.f32.partialorder %v1724_v22, 0.1 }
 0x20c   :  { %v2365_v54 = vpop.f32.mrb[4].mxu1  ;;  %v3873_v3 = vsel %vm1732_vm5, %v1724_v22, 0.0  ;;  %vm1731_vm6 = vcmp.gt.f32.partialorder %v1723_v5, 0.1 }
 0x20d   :  { %v1726_v2 = vmul.f32 0.25, %v2365_v54  ;;  %v1694_v38 = vpop.f32.mrb[5].mxu1  ;;  %v1754_v40 = vsel %vm859_vm2, %v3873_v3, 0.0  ;;  %v3877_v42 = vsel %vm1731_vm6, %v1723_v5, 0.0 }
 0x20e   :  { %v1725_v45 = vmul.f32 0.25, %v1694_v38  ;;  %1755 = vadd.xlane.f32.xlu1 %v1754_v40  ;;  %v1751_v29 = vsel %vm859_vm2, %v3877_v42, 0.0 }
 0x20f   :  { %1752 = vadd.xlane.f32.xlu0 %v1751_v29  ;;  %vm1734_vm7 = vcmp.gt.f32.partialorder %v1726_v2, 0.1 }
 0x210   :  { %v2368_v11 = vpop.f32.mrb[6].mxu1  ;;  %v3881_v7 = vsel %vm1734_vm7, %v1726_v2, 0.0  ;;  %vm1733_vm8 = vcmp.gt.f32.partialorder %v1725_v45, 0.1 }
 0x211   :  { %v1728_v1 = vmul.f32 0.25, %v2368_v11  ;;  %v1704_v63 = vpop.f32.mrb[7].mxu1  ;;  %v1760_v35 = vsel %vm859_vm2, %v3881_v7, 0.0  ;;  %v3885_v49 = vsel %vm1733_vm8, %v1725_v45, 0.0 }
 0x212   :  { %v1727_v19 = vmul.f32 0.25, %v1704_v63  ;;  %1761 = vadd.xlane.f32.xlu1 %v1760_v35  ;;  %v1757_v4 = vsel %vm859_vm2, %v3885_v49, 0.0 }
 0x213   :  { %1758 = vadd.xlane.f32.xlu0 %v1757_v4  ;;  %vm1736_vm9 = vcmp.gt.f32.partialorder %v1728_v1, 0.1 }
 0x214   :  { %vm1735_vm10 = vcmp.gt.f32.partialorder %v1727_v19, 0.1  ;;  %v3889_v13 = vsel %vm1736_vm9, %v1728_v1, 0.0 }
 0x215   :  { %v1766_v30 = vsel %vm859_vm2, %v3889_v13, 0.0  ;;  %v3893_v57 = vsel %vm1735_vm10, %v1727_v19, 0.0 }
 0x216   :  { %1767 = vadd.xlane.f32.xlu1 %v1766_v30  ;;  %v1763_v41 = vsel %vm859_vm2, %v3893_v57, 0.0 }
 0x217   :  { %1764 = vadd.xlane.f32.xlu0 %v1763_v41 }
 0x220   :  { %v2247_v51 = vpop.f32.mrb[0].mxu0 }
 0x221   :  { %v836_v27 = vmul.f32 0.25, %v2247_v51  ;;  %v788_v26 = vpop.f32.mrb[1].mxu0 }
 0x222   :  { %v835_v48 = vmul.f32 0.25, %v788_v26 }
 0x223   :  { %vm844_vm11 = vcmp.gt.f32.partialorder %v836_v27, 0.1 }
 0x224   :  { %v2250_v10 = vpop.f32.mrb[2].mxu0  ;;  %v3897_v59 = vsel %vm844_vm11, %v836_v27, 0.0  ;;  %vm843_vm12 = vcmp.gt.f32.partialorder %v835_v48, 0.1 }
 0x225   :  { %v838_v16 = vmul.f32 0.25, %v2250_v10  ;;  %v798_v58 = vpop.f32.mrb[3].mxu0  ;;  %v863_v8 = vsel %vm859_vm2, %v3897_v59, 0.0  ;;  %v3901_v0 = vsel %vm843_vm12, %v835_v48, 0.0 }
 0x226   :  { %v837_v28 = vmul.f32 0.25, %v798_v58  ;;  %864 = vadd.xlane.f32.xlu1 %v863_v8  ;;  %v860_v15 = vsel %vm859_vm2, %v3901_v0, 0.0 }
 0x227   :  { %861 = vadd.xlane.f32.xlu0 %v860_v15  ;;  %vm846_vm13 = vcmp.gt.f32.partialorder %v838_v16, 0.1 }
 0x228   :  { %v2253_v52 = vpop.f32.mrb[4].mxu0  ;;  %v3905_v31 = vsel %vm846_vm13, %v838_v16, 0.0  ;;  %vm845_vm14 = vcmp.gt.f32.partialorder %v837_v28, 0.1 }
 0x229   :  { %v840_v12 = vmul.f32 0.25, %v2253_v52  ;;  %v808_v50 = vpop.f32.mrb[5].mxu0  ;;  %v869_v47 = vsel %vm859_vm2, %v3905_v31, 0.0  ;;  %v3909_v24 = vsel %vm845_vm14, %v837_v28, 0.0 }
 0x22a   :  { %v839_v44 = vmul.f32 0.25, %v808_v50  ;;  %870 = vadd.xlane.f32.xlu1 %v869_v47  ;;  %v866_v18 = vsel %vm859_vm2, %v3909_v24, 0.0 }
 0x22b   :  { %867 = vadd.xlane.f32.xlu0 %v866_v18  ;;  %vm848_vm15 = vcmp.gt.f32.partialorder %v840_v12, 0.1 }
 0x22c   :  { %v2256_v39 = vpop.f32.mrb[6].mxu0  ;;  %v3913_v53 = vsel %vm848_vm15, %v840_v12, 0.0  ;;  %vm847_vm0 = vcmp.gt.f32.partialorder %v839_v44, 0.1 }
 0x22d   :  { %v842_v56 = vmul.f32 0.25, %v2256_v39  ;;  %v818_v37 = vpop.f32.mrb[7].mxu0  ;;  %v875_v20 = vsel %vm859_vm2, %v3913_v53, 0.0  ;;  %v3917_v34 = vsel %vm847_vm0, %v839_v44, 0.0 }
 0x22e   :  { %v841_v55 = vmul.f32 0.25, %v818_v37  ;;  %876 = vadd.xlane.f32.xlu1 %v875_v20  ;;  %v872_v43 = vsel %vm859_vm2, %v3917_v34, 0.0  ;;  %v1833_v20 = vld [vmem:[%s3993_s4] sm:$0xff] }
 0x22f   :  { %873 = vadd.xlane.f32.xlu0 %v872_v43  ;;  %vm850_vm1 = vcmp.gt.f32.partialorder %v842_v56, 0.1 }
 0x230   :  { %vm849_vm3 = vcmp.gt.f32.partialorder %v841_v55, 0.1  ;;  %v3921_v61 = vsel %vm850_vm1, %v842_v56, 0.0  ;;  %v1834_v56 = vld [vmem:[%s3993_s4 + $0x8] sm:$0xff] }
 0x231   :  { %v881_v9 = vsel %vm859_vm2, %v3921_v61, 0.0  ;;  %v3925_v32 = vsel %vm849_vm3, %v841_v55, 0.0 }
 0x232   :  { %882 = vadd.xlane.f32.xlu1 %v881_v9  ;;  %v878_v62 = vsel %vm859_vm2, %v3925_v32, 0.0  ;;  %v1842_v9 = vmul.f32 0.5, %v1834_v56 }
 0x233   :  { %879 = vadd.xlane.f32.xlu0 %v878_v62 }
 0x297   :  { %v1750_v33 = vpop.xlane.xlu1 %1749 }
 0x298   :  { %v1770_v17 = vadd.f32 1e-12, %v1750_v33  ;;  %v1747_v60 = vpop.xlane.xlu0 %1746 }
 0x299   :  { %v1769_v14 = vadd.f32 1e-12, %v1747_v60  ;;  %v1841_v60 = vmul.f32 0.5, %v1833_v20 }
 0x29a   :  { %2741 = vrcp.f32 %v1770_v17 }
 0x29b   :  { %2743 = vrcp.f32 %v1769_v14  ;;  %v1756_v6 = vpop.xlane.xlu1 %1755 }
 0x29c   :  { %v1772_v22 = vadd.f32 1e-12, %v1756_v6  ;;  %v1753_v23 = vpop.xlane.xlu0 %1752  ;;  %v1836_v6 = vld [vmem:[%s3993_s4 + $0x18] sm:$0xff] }
 0x29d   :  { %v1771_v36 = vadd.f32 1e-12, %v1753_v23 }
 0x29e   :  { %2745 = vrcp.f32 %v1772_v22 }
 0x29f   :  { %v1762_v5 = vpop.xlane.xlu1 %1761  ;;  %2747 = vrcp.f32 %v1771_v36 }
 0x2a0   :  { %v1774_v46 = vadd.f32 1e-12, %v1762_v5  ;;  %v1759_v54 = vpop.xlane.xlu0 %1758 }
 0x2a1   :  { %v1773_v2 = vadd.f32 1e-12, %v1759_v54  ;;  %v1844_v54 = vmul.f32 0.5, %v1836_v6 }
 0x2a3   :  { %2749 = vrcp.f32 %v1773_v2  ;;  %v1768_v38 = vpop.xlane.xlu1 %1767 }
 0x2a4   :  { %v2742_v40 = vpop.eup %2741  ;;  %2751 = vrcp.f32 %v1774_v46  ;;  %v1776_v45 = vadd.f32 1e-12, %v1768_v38  ;;  %v1765_v29 = vpop.xlane.xlu0 %1764 }
 0x2a5   :  { %v2744_v11 = vpop.eup %2743  ;;  %v1775_v1 = vadd.f32 1e-12, %v1765_v29  ;;  %v1780_v63 = vmul.f32 %v2742_v40, %v3865_v21 }
 0x2a6   :  { %v1778_v35 = vmul.f32 %v2744_v11, %v3869_v25  ;;  %v1837_v11 = vld [vmem:[%s3993_s4 + $0x20] sm:$0xff] }
 0x2a7   :  { %2753 = vrcp.f32 %v1775_v1  ;;  %1803 = vrot.lane.b32.xlu1 %v1780_v63, %s2797_s0 }
 0x2a8   :  { %v2746_v19 = vpop.eup %2745  ;;  %2755 = vrcp.f32 %v1776_v45  ;;  %1801 = vrot.lane.b32.xlu0 %v1778_v35, %s2797_s0  ;;  %v1835_v45 = vld [vmem:[%s3993_s4 + $0x10] sm:$0xff] }
 0x2a9   :  { %v1784_v4 = vmul.f32 %v2746_v19, %v3873_v3  ;;  %v2748_v30 = vpop.eup %2747  ;;  %v1843_v35 = vmul.f32 0.5, %v1835_v45 }
 0x2aa   :  { %v1782_v51 = vmul.f32 %v2748_v30, %v3877_v42 }
 0x2ab   :  { %1807 = vrot.lane.b32.xlu1 %v1784_v4, %s2797_s0 }
 0x2ad   :  { %v2750_v41 = vpop.eup %2749 }
 0x2ae   :  { %v2752_v27 = vpop.eup %2751  ;;  %v1786_v26 = vmul.f32 %v2750_v41, %v3885_v49 }
 0x2af   :  { %1805 = vrot.lane.b32.xlu1 %v1782_v51, %s2797_s0  ;;  %v1788_v25 = vmul.f32 %v2752_v27, %v3881_v7  ;;  %v1845_v51 = vmul.f32 0.5, %v1837_v11 }
 0x2b0   :  { %1809 = vrot.lane.b32.xlu0 %v1786_v26, %s2797_s0  ;;  %v1838_v26 = vld [vmem:[%s3993_s4 + $0x28] sm:$0xff] }
 0x2b1   :  { %v2754_v21 = vpop.eup %2753 }
 0x2b2   :  { %v2756_v48 = vpop.eup %2755  ;;  %v1790_v10 = vmul.f32 %v2754_v21, %v3893_v57 }
 0x2b3   :  { %1811 = vrot.lane.b32.xlu1 %v1788_v25, %s2797_s0  ;;  %v1792_v3 = vmul.f32 %v2756_v48, %v3889_v13  ;;  %v865_v58 = vpop.xlane.xlu1 %864 }
 0x2b4   :  { %1813 = vrot.lane.b32.xlu0 %v1790_v10, %s2797_s0  ;;  %v862_v16 = vpop.xlane.xlu0 %861  ;;  %v885_v42 = vadd.f32 1e-12, %v865_v58 }
 0x2b5   :  { %v884_v28 = vadd.f32 1e-12, %v862_v16  ;;  %v1846_v16 = vmul.f32 0.5, %v1838_v26 }
 0x2b6   :  { %2757 = vrcp.f32 %v885_v42 }
 0x2b7   :  { %1815 = vrot.lane.b32.xlu1 %v1792_v3, %s2797_s0  ;;  %v871_v15 = vpop.xlane.xlu1 %870  ;;  %2759 = vrcp.f32 %v884_v28 }
 0x2b8   :  { %v868_v8 = vpop.xlane.xlu0 %867  ;;  %v887_v49 = vadd.f32 1e-12, %v871_v15 }
 0x2b9   :  { %v886_v7 = vadd.f32 1e-12, %v868_v8 }
 0x2ba   :  { %2761 = vrcp.f32 %v887_v49 }
 0x2bb   :  { %v877_v12 = vpop.xlane.xlu1 %876  ;;  %2763 = vrcp.f32 %v886_v7 }
 0x2bc   :  { %v874_v52 = vpop.xlane.xlu0 %873  ;;  %v889_v47 = vadd.f32 1e-12, %v877_v12 }
 0x2bd   :  { %v888_v50 = vadd.f32 1e-12, %v874_v52  ;;  %v1840_v52 = vld [vmem:[%s3993_s4 + $0x38] sm:$0xff] }
 0x2bf   :  { %2765 = vrcp.f32 %v888_v50  ;;  %v883_v13 = vpop.xlane.xlu1 %882 }
 0x2c0   :  { %v880_v57 = vpop.xlane.xlu0 %879  ;;  %v2758_v18 = vpop.eup %2757  ;;  %2767 = vrcp.f32 %v889_v47  ;;  %v891_v37 = vadd.f32 1e-12, %v883_v13  ;;  %v1848_v47 = vmul.f32 0.5, %v1840_v52 }
 0x2c1   :  { %v890_v44 = vadd.f32 1e-12, %v880_v57  ;;  %v2760_v39 = vpop.eup %2759  ;;  %v895_v55 = vmul.f32 %v2758_v18, %v3897_v59 }
 0x2c2   :  { %v893_v33 = vmul.f32 %v2760_v39, %v3901_v0 }
 0x2c3   :  { %2769 = vrcp.f32 %v890_v44 }
 0x2c4   :  { %v2762_v43 = vpop.eup %2761  ;;  %2771 = vrcp.f32 %v891_v37 }
 0x2c5   :  { %v899_v59 = vmul.f32 %v2762_v43, %v3905_v31  ;;  %v2764_v5 = vpop.eup %2763 }
 0x2c6   :  { %v897_v31 = vmul.f32 %v2764_v5, %v3909_v24  ;;  %v1839_v24 = vld [vmem:[%s3993_s4 + $0x30] sm:$0xff]  ;;  %s2773_s4 = scalar_lea.vmem %s1879_s15, 1024 }
 0x2c7   :  { %v1847_v15 = vmul.f32 0.5, %v1839_v24  ;;  %p2774_p0 = scmp.ne.s32.totalorder %s1879_s15, %s2773_s4  ;;  %p2779_p2 = scmp.lt.s32.totalorder %s2773_s4, %s2773_s4 }
 0x2c9   :  { %v2766_v0 = vpop.eup %2765  ;;  %p2780_p3 = por %p2779_p2, %p2778_p1 }
 0x2ca   :  { %v2768_v1 = vpop.eup %2767  ;;  %v901_v4 = vmul.f32 %v2766_v0, %v3917_v34 }
 0x2cb   :  { %v903_v34 = vmul.f32 %v2768_v1, %v3913_v53  ;;  %p2781_p4 = pnand %p2780_p3, %p2774_p0 }
 0x2cd   :  { %v2770_v30 = vpop.eup %2769 }
 0x2ce   :  { %v2772_v10 = vpop.eup %2771  ;;  %v905_v8 = vmul.f32 %v2770_v30, %v3925_v32 }
 0x2cf   :  { %v907_v50 = vmul.f32 %v2772_v10, %v3921_v61 }
 0x319   :  { %v1804_v62 = vpop.permute.xlu1 %1803 }
 0x31a   :  { %v1826_v17 = vsel %vm859_vm2, %v895_v55, %v1804_v62  ;;  %v1802_v14 = vpop.permute.xlu0 %1801 }
 0x31b   :  { %v1850_v22 = vmul.f32 0.5, %v1826_v17  ;;  %v1825_v23 = vsel %vm859_vm2, %v893_v33, %v1802_v14 }
 0x31c   :  { %v1849_v36 = vmul.f32 0.5, %v1825_v23 }
 0x31d   :  { %v1858_v46 = vadd.f32 %v1850_v22, %v1842_v9  ;;  %v1808_v2 = vpop.permute.xlu1 %1807 }
 0x31e   :  { %v1857_v38 = vadd.f32 %v1849_v36, %v1841_v60  ;;  %v1828_v40 = vsel %vm859_vm2, %v899_v59, %v1808_v2 }
 0x31f   :  { %1866 = vst [vmem:[#allocation2 + $0x8] sm:$0xff] %v1858_v46  ;;  %v1852_v29 = vmul.f32 0.5, %v1828_v40 }
 0x320   :  { %1865 = vst [vmem:[#allocation2] sm:$0xff] %v1857_v38 }
 0x321   :  { %v1860_v63 = vadd.f32 %v1852_v29, %v1844_v54  ;;  %v1806_v19 = vpop.permute.xlu1 %1805 }
 0x322   :  { %v1827_v41 = vsel %vm859_vm2, %v897_v31, %v1806_v19  ;;  %v1810_v27 = vpop.permute.xlu0 %1809 }
 0x323   :  { %1868 = vst [vmem:[#allocation2 + $0x18] sm:$0xff] %v1860_v63  ;;  %v1851_v21 = vmul.f32 0.5, %v1827_v41  ;;  %v1829_v25 = vsel %vm859_vm2, %v901_v4, %v1810_v27 }
 0x324   :  { %v1853_v48 = vmul.f32 0.5, %v1829_v25 }
 0x325   :  { %v1859_v3 = vadd.f32 %v1851_v21, %v1843_v35  ;;  %v1812_v58 = vpop.permute.xlu1 %1811 }
 0x326   :  { %v1861_v42 = vadd.f32 %v1853_v48, %v1845_v51  ;;  %v1830_v28 = vsel %vm859_vm2, %v903_v34, %v1812_v58  ;;  %v1814_v49 = vpop.permute.xlu0 %1813 }
 0x327   :  { %1867 = vst [vmem:[#allocation2 + $0x10] sm:$0xff] %v1859_v3  ;;  %v1854_v12 = vmul.f32 0.5, %v1830_v28  ;;  %v1831_v7 = vsel %vm859_vm2, %v905_v8, %v1814_v49 }
 0x328   :  { %1869 = vst [vmem:[#allocation2 + $0x20] sm:$0xff] %v1861_v42  ;;  %v1855_v53 = vmul.f32 0.5, %v1831_v7 }
 0x329   :  { %v1862_v57 = vadd.f32 %v1854_v12, %v1846_v16  ;;  %v1816_v32 = vpop.permute.xlu1 %1815 }
 0x32a   :  { %v1863_v13 = vadd.f32 %v1855_v53, %v1847_v15  ;;  %v1832_v44 = vsel %vm859_vm2, %v907_v50, %v1816_v32 }
 0x32b   :  { %1870 = vst [vmem:[#allocation2 + $0x28] sm:$0xff] %v1862_v57  ;;  %v1856_v18 = vmul.f32 0.5, %v1832_v44 }
 0x32c   :  { %1871 = vst [vmem:[#allocation2 + $0x30] sm:$0xff] %v1863_v13 }
 0x32d   :  { %v1864_v39 = vadd.f32 %v1856_v18, %v1848_v47 }
 0x32f   :  { %1872 = vst [vmem:[#allocation2 + $0x38] sm:$0xff] %v1864_v39 }
 0x330   :  { %2784 = shalt.err (!%p2781_p4)
}
 0x331   :  { %s2785_s18 = scalar_lea.hbm %s3994_s5, 1024 }
 0x332   :  { %p2786_p5 = scmp.ne.s32.totalorder %s3994_s5, %s2785_s18  ;;  %p2789_p6 = scmp.lt.u32.totalorder %s2785_s18, %s3994_s5 }
 0x334   :  { %p2791_p7 = pnand %p2789_p6, %p2786_p5 }
 0x336   :  { %2794 = shalt.err (!%p2791_p7)
}
 0x337   :  { %s2799_s23 = smov 128   ;;  %s2800_s24 = smov 8  }
 0x338   :  { %1884 = dma.vmem_to_hbm [thread:$0]  %s1879_s15, 1024, %s3994_s5, [#allocation3], %s2799_s23, %s2799_s23, %s2800_s24  }
 0x339   :  { %2795 = dma.done.wait [#allocation3], 1024  }
 0x33a   :  { %2796 = vsyncadd [#allocation3], 4294966272 }
 0x33b   :  { %1888 = vsyncpa [#allocation3], 1 }

</bundles_post_ra>
